<compile_context>
chip_gen: v6e
topology: v6e:2x2x1
jax: 0.10.0
libtpu: 0.0.40
codegen_flags: <defaults>
</compile_context>

<pallas_src>
import functools
import math

import jax
import jax.numpy as jnp
from jax.experimental import pallas as pl
from jax.experimental.pallas import tpu as pltpu


def _layernorm(x, gamma, beta, eps=1e-5):
    mu = jnp.mean(x, axis=-1, keepdims=True)
    var = jnp.mean((x - mu) ** 2, axis=-1, keepdims=True)
    return (x - mu) * jax.lax.rsqrt(var + eps) * gamma + beta


def gsasrec_block_kernel(seq_ref, mask_ref,
                         ln1_g_ref, ln1_b_ref, ln2_g_ref, ln2_b_ref,
                         wq_ref, bq_ref, wk_ref, bk_ref, wv_ref, bv_ref,
                         wo_ref, bo_ref, w1_ref, b1_ref, w2_ref, b2_ref,
                         fin_g_ref, fin_b_ref,
                         out_ref, attn_ref,
                         seq_scr, ctx_scr,
                         *, num_heads):
    blk = pl.program_id(1)                      # transformer-block grid axis
    Bt, S, D = seq_ref.shape
    H = num_heads
    Dh = D // H
    R = Bt * S
    scale = jnp.float32(1.0 / math.sqrt(Dh))

    # Residual-stream carry: (re)load from HBM at the first block of every
    # batch tile; it stays resident in VMEM scratch across the block axis.
    @pl.when(blk == 0)
    def _():
        seq_scr[...] = seq_ref[...].reshape(R, D)

    seq = seq_scr[...]                          # (R, D) f32
    mask = mask_ref[...].reshape(R, 1)          # (R, 1) f32

    # ---- pre-norm causal multi-head self-attention ----
    x = _layernorm(seq, ln1_g_ref[0], ln1_b_ref[0])
    xb = x.astype(jnp.bfloat16)

    # Lane-dense fused projections: one (R, D) @ (D, D) matmul each.
    q = (jnp.dot(xb, wq_ref[0], preferred_element_type=jnp.float32)
         + bq_ref[0]) * scale
    k = jnp.dot(xb, wk_ref[0], preferred_element_type=jnp.float32) + bk_ref[0]
    v = jnp.dot(xb, wv_ref[0], preferred_element_type=jnp.float32) + bv_ref[0]

    row = jax.lax.broadcasted_iota(jnp.int32, (S, S), 0)
    col = jax.lax.broadcasted_iota(jnp.int32, (S, S), 1)
    causal = (col <= row)[None, :, :]           # (1, S, S), broadcast over batch
    neg_big = jnp.float32(-1e30)

    attn_sum = jnp.zeros((Bt, S, S), jnp.float32)
    for h in range(H):                          # static lane slices per head
        sl = slice(h * Dh, (h + 1) * Dh)
        qh = q[:, sl].reshape(Bt, S, Dh).astype(jnp.bfloat16)
        kh = k[:, sl].reshape(Bt, S, Dh).astype(jnp.bfloat16)
        vh = v[:, sl].reshape(Bt, S, Dh).astype(jnp.bfloat16)

        s = jnp.einsum('bqd,bkd->bqk', qh, kh,
                       preferred_element_type=jnp.float32)        # (Bt, S, S)
        s = jnp.where(causal, s, neg_big)
        s = s - jnp.max(s, axis=-1, keepdims=True)
        p = jnp.exp(s)
        p = p * pl.reciprocal(jnp.sum(p, axis=-1, keepdims=True), approx=True)
        attn_sum = attn_sum + p

        ctx = jnp.einsum('bqk,bkd->bqd', p.astype(jnp.bfloat16), vh,
                         preferred_element_type=jnp.float32)      # (Bt, S, Dh)
        ctx_scr[:, sl] = ctx.reshape(R, Dh)

    # head-averaged attention weights (torch MultiheadAttention default)
    attn_ref[0] = attn_sum * jnp.float32(1.0 / H)

    # Single lane-dense (R, D) @ (D, D) output projection on the context slab.
    attn_out = jnp.dot(ctx_scr[...].astype(jnp.bfloat16), wo_ref[0],
                       preferred_element_type=jnp.float32) + bo_ref[0]

    x2 = seq + attn_out

    # ---- pre-norm position-wise feed-forward ----
    y = _layernorm(x2, ln2_g_ref[0], ln2_b_ref[0])
    h1 = jnp.dot(y.astype(jnp.bfloat16), w1_ref[0],
                 preferred_element_type=jnp.float32) + b1_ref[0]
    h1 = jnp.maximum(h1, 0.0)
    ffn = jnp.dot(h1.astype(jnp.bfloat16), w2_ref[0],
                  preferred_element_type=jnp.float32) + b2_ref[0]

    new_seq = (x2 + ffn) * mask
    seq_scr[...] = new_seq

    # ---- final sequence LayerNorm, fused; store output at the last block ----
    @pl.when(blk == pl.num_programs(1) - 1)
    def _():
        out_ref[...] = _layernorm(new_seq, fin_g_ref[...],
                                  fin_b_ref[...]).reshape(Bt, S, D)


def _batch_spec(shape):
    nd = len(shape)
    return pl.BlockSpec(shape, lambda b, blk, _n=nd: (b,) + (0,) * (_n - 1))


def _block_spec(shape):
    nd = len(shape)
    return pl.BlockSpec(shape, lambda b, blk, _n=nd: (blk,) + (0,) * (_n - 1))


def _const_spec(shape):
    nd = len(shape)
    return pl.BlockSpec(shape, lambda b, blk, _n=nd: (0,) * _n)


def _pick_batch_tile(batch, seq_len):
    """Largest divisor of `batch` that (a) leaves >= 2 parallel grid steps so
    v7x's second TensorCore gets work and (b) keeps the (Bt*S, D) slab around
    ~512 rows to bound VMEM while amortizing per-grid-step overhead."""
    if batch <= 1:
        return 1
    max_bt = max(1, batch // 2)
    row_target = 512
    best = 1
    for cand in range(1, max_bt + 1):
        if batch % cand == 0 and cand * seq_len <= max(row_target, seq_len):
            best = cand
    return best


def _vmem_limit_bytes(batch_tile, S, D, Dff, H):
    f32, bf16 = 4, 2
    R = batch_tile * S
    weights = (4 * D * D + 2 * D * Dff) * bf16           # per-block matmul weights
    small = (6 * D + Dff + 2 * D) * f32                  # biases + LN params
    io = (2 * R * D + R) * f32                           # seq + out + mask tiles
    attn = batch_tile * S * S * f32                      # attention out tile
    scratch = 2 * R * D * f32                            # residual + ctx carries
    acts = (R * (4 * D + Dff) + (H + 1) * batch_tile * S * S) * f32
    est = 2 * (weights + small + io + attn) + scratch + acts   # x2: double-buffering
    # Floor at the 32 MiB default; cap at 48 MiB to keep headroom under v7x's
    # 64 MiB physical VMEM (v5e/v6e have 128 MiB physical).
    return int(min(max(3 * est, 32 * 2 ** 20), 48 * 2 ** 20))


def gsasrec_forward(seq, mask, params, *, num_heads, num_blocks, batch_tile):
    B, S, D = seq.shape
    NB = num_blocks
    Dff = params["w1"].shape[-1]
    n_bt = B // batch_tile
    grid = (n_bt, NB)          # (batch tiles [parallel], blocks [arbitrary])

    kernel = functools.partial(gsasrec_block_kernel, num_heads=num_heads)

    in_specs = [
        _batch_spec((batch_tile, S, D)),                     # seq
        _batch_spec((batch_tile, S, 1)),                     # mask
        _block_spec((1, 1, D)), _block_spec((1, 1, D)),      # ln1 gamma / beta
        _block_spec((1, 1, D)), _block_spec((1, 1, D)),      # ln2 gamma / beta
        _block_spec((1, D, D)), _block_spec((1, 1, D)),      # Wq / bq
        _block_spec((1, D, D)), _block_spec((1, 1, D)),      # Wk / bk
        _block_spec((1, D, D)), _block_spec((1, 1, D)),      # Wv / bv
        _block_spec((1, D, D)), _block_spec((1, 1, D)),      # Wo / bo
        _block_spec((1, D, Dff)), _block_spec((1, 1, Dff)),  # FFN W1 / b1
        _block_spec((1, Dff, D)), _block_spec((1, 1, D)),    # FFN W2 / b2
        _const_spec((1, D)), _const_spec((1, D)),            # final LN
    ]
    out_specs = (
        _batch_spec((batch_tile, S, D)),                     # seq_emb (carried)
        pl.BlockSpec((1, batch_tile, S, S), lambda b, blk: (blk, b, 0, 0)),
    )
    out_shape = (
        jax.ShapeDtypeStruct((B, S, D), jnp.float32),
        jax.ShapeDtypeStruct((NB, B, S, S), jnp.float32),
    )
    scratch_shapes = [
        pltpu.VMEM((batch_tile * S, D), jnp.float32),        # residual carry
        pltpu.VMEM((batch_tile * S, D), jnp.float32),        # per-head ctx slab
    ]
    # TODO(synk): emit attention weights in bf16 / lane-dense layout (or make
    # them optional) when callers do not need f32 weights; at realistic S they
    # dominate HBM writes.
    return pl.pallas_call(
        kernel,
        grid=grid,
        in_specs=in_specs,
        out_specs=out_specs,
        out_shape=out_shape,
        scratch_shapes=scratch_shapes,
        compiler_params=pltpu.CompilerParams(
            dimension_semantics=("parallel", "arbitrary"),
            vmem_limit_bytes=_vmem_limit_bytes(batch_tile, S, D, Dff, num_heads)),
    )(
        seq, mask,
        params["ln1_g"], params["ln1_b"], params["ln2_g"], params["ln2_b"],
        params["wq"], params["bq"], params["wk"], params["bk"],
        params["wv"], params["bv"], params["wo"], params["bo"],
        params["w1"], params["b1"], params["w2"], params["b2"],
        params["fin_g"], params["fin_b"],
    )


class GSASRecPallas:
    def __init__(self, num_items, sequence_length=8, embedding_dim=32,
                 num_heads=4, num_blocks=3, seed=0):
        self.num_items = num_items
        self.sequence_length = sequence_length
        self.embedding_dim = embedding_dim
        self.num_heads = num_heads
        self.num_blocks = num_blocks

        D = embedding_dim
        NB = num_blocks
        Dff = D                       # dim_feedforward == embedding_dim in spec
        vocab = num_items + 2

        key = jax.random.PRNGKey(seed)
        ks = jax.random.split(key, 2 + NB)

        def normal(k, shape, std=0.02):
            return (std * jax.random.normal(k, shape)).astype(jnp.float32)

        self.item_embedding = normal(ks[0], (vocab, D))
        self.position_embedding = normal(ks[1], (sequence_length, D))

        wq_l, wk_l, wv_l, wo_l, w1_l, w2_l = [], [], [], [], [], []
        for i in range(NB):
            bk = jax.random.split(ks[2 + i], 6)
            wq_l.append(normal(bk[0], (D, D)))
            wk_l.append(normal(bk[1], (D, D)))
            wv_l.append(normal(bk[2], (D, D)))
            wo_l.append(normal(bk[3], (D, D)))
            w1_l.append(normal(bk[4], (D, Dff)))
            w2_l.append(normal(bk[5], (Dff, D)))

        bf16 = jnp.bfloat16
        f32 = jnp.float32
        self.params = dict(
            ln1_g=jnp.ones((NB, 1, D), f32), ln1_b=jnp.zeros((NB, 1, D), f32),
            ln2_g=jnp.ones((NB, 1, D), f32), ln2_b=jnp.zeros((NB, 1, D), f32),
            wq=jnp.stack(wq_l).astype(bf16), bq=jnp.zeros((NB, 1, D), f32),
            wk=jnp.stack(wk_l).astype(bf16), bk=jnp.zeros((NB, 1, D), f32),
            wv=jnp.stack(wv_l).astype(bf16), bv=jnp.zeros((NB, 1, D), f32),
            wo=jnp.stack(wo_l).astype(bf16), bo=jnp.zeros((NB, 1, D), f32),
            w1=jnp.stack(w1_l).astype(bf16), b1=jnp.zeros((NB, 1, Dff), f32),
            w2=jnp.stack(w2_l).astype(bf16), b2=jnp.zeros((NB, 1, D), f32),
            fin_g=jnp.ones((1, D), f32), fin_b=jnp.zeros((1, D), f32),
        )

    def __call__(self, input_ids):
        # input_ids: int32 [B, S]
        B, S = input_ids.shape
        seq = self.item_embedding[input_ids]                                  # (B,S,D)
        mask = (input_ids != self.num_items + 1).astype(jnp.float32)[..., None]
        seq = seq + self.position_embedding[:S][None, :, :]
        seq = seq * mask                     # dropout = identity in eval mode

        bt = _pick_batch_tile(B, S)
        seq_emb, attn_stacked = gsasrec_forward(
            seq, mask, self.params,
            num_heads=self.num_heads, num_blocks=self.num_blocks,
            batch_tile=bt)
        attentions = [attn_stacked[i] for i in range(self.num_blocks)]
        return seq_emb, attentions


if __name__ == "__main__":
    num_items = 50
    B, S, D, H, NB = 2, 8, 32, 4, 3

    model = GSASRecPallas(num_items, sequence_length=S, embedding_dim=D,
                          num_heads=H, num_blocks=NB, seed=0)

    key = jax.random.PRNGKey(0)
    ids = jax.random.randint(key, (B, S), minval=1, maxval=num_items + 1,
                             dtype=jnp.int32)
    # include a couple of padding tokens (id = num_items + 1) to exercise the mask
    ids = ids.at[0, 0].set(num_items + 1).at[1, 0].set(num_items + 1)

    seq_emb, attentions = model(ids)
    seq_emb = jax.block_until_ready(seq_emb)
    for a in attentions:
        jax.block_until_ready(a)

    assert seq_emb.shape == (B, S, D)
    assert len(attentions) == NB and attentions[0].shape == (B, S, S)
    assert bool(jnp.all(jnp.isfinite(seq_emb)))
    for a in attentions:
        assert bool(jnp.all(jnp.isfinite(a)))
    print("KERNEL_OK")
</pallas_src>

<mosaic_0001>
module attributes {stable_mosaic.version = 11 : i64} {
  func.func @gsasrec_block_kernel(%arg0: i32, %arg1: i32, %arg2: memref<1x8x32xf32, #tpu.memory_space<vmem>>, %arg3: memref<1x8x1xf32, #tpu.memory_space<vmem>>, %arg4: memref<1x1x32xf32, #tpu.memory_space<vmem>>, %arg5: memref<1x1x32xf32, #tpu.memory_space<vmem>>, %arg6: memref<1x1x32xf32, #tpu.memory_space<vmem>>, %arg7: memref<1x1x32xf32, #tpu.memory_space<vmem>>, %arg8: memref<1x32x32xbf16, #tpu.memory_space<vmem>>, %arg9: memref<1x1x32xf32, #tpu.memory_space<vmem>>, %arg10: memref<1x32x32xbf16, #tpu.memory_space<vmem>>, %arg11: memref<1x1x32xf32, #tpu.memory_space<vmem>>, %arg12: memref<1x32x32xbf16, #tpu.memory_space<vmem>>, %arg13: memref<1x1x32xf32, #tpu.memory_space<vmem>>, %arg14: memref<1x32x32xbf16, #tpu.memory_space<vmem>>, %arg15: memref<1x1x32xf32, #tpu.memory_space<vmem>>, %arg16: memref<1x32x32xbf16, #tpu.memory_space<vmem>>, %arg17: memref<1x1x32xf32, #tpu.memory_space<vmem>>, %arg18: memref<1x32x32xbf16, #tpu.memory_space<vmem>>, %arg19: memref<1x1x32xf32, #tpu.memory_space<vmem>>, %arg20: memref<1x32xf32, #tpu.memory_space<vmem>>, %arg21: memref<1x32xf32, #tpu.memory_space<vmem>>, %arg22: memref<1x8x32xf32, #tpu.memory_space<vmem>>, %arg23: memref<1x1x8x8xf32, #tpu.memory_space<vmem>>, %arg24: memref<8x32xf32, #tpu.memory_space<vmem>>, %arg25: memref<8x32xf32, #tpu.memory_space<vmem>>) attributes {dimension_semantics = [#tpu.dimension_semantics<parallel>, #tpu.dimension_semantics<arbitrary>], iteration_bounds = array<i64: 2, 3>, scalar_prefetch = 0 : i64, scratch_operands = 2 : i64, tpu.core_type = #tpu.core_type<tc>, window_params = [{transform_indices = @transform_0, window_bounds = array<i64: 1, 8, 32>}, {transform_indices = @transform_1, window_bounds = array<i64: 1, 8, 1>}, {transform_indices = @transform_2, window_bounds = array<i64: 1, 1, 32>}, {transform_indices = @transform_3, window_bounds = array<i64: 1, 1, 32>}, {transform_indices = @transform_4, window_bounds = array<i64: 1, 1, 32>}, {transform_indices = @transform_5, window_bounds = array<i64: 1, 1, 32>}, {transform_indices = @transform_6, window_bounds = array<i64: 1, 32, 32>}, {transform_indices = @transform_7, window_bounds = array<i64: 1, 1, 32>}, {transform_indices = @transform_8, window_bounds = array<i64: 1, 32, 32>}, {transform_indices = @transform_9, window_bounds = array<i64: 1, 1, 32>}, {transform_indices = @transform_10, window_bounds = array<i64: 1, 32, 32>}, {transform_indices = @transform_11, window_bounds = array<i64: 1, 1, 32>}, {transform_indices = @transform_12, window_bounds = array<i64: 1, 32, 32>}, {transform_indices = @transform_13, window_bounds = array<i64: 1, 1, 32>}, {transform_indices = @transform_14, window_bounds = array<i64: 1, 32, 32>}, {transform_indices = @transform_15, window_bounds = array<i64: 1, 1, 32>}, {transform_indices = @transform_16, window_bounds = array<i64: 1, 32, 32>}, {transform_indices = @transform_17, window_bounds = array<i64: 1, 1, 32>}, {pipeline_mode = #tpu.pipeline_mode<synchronous>, transform_indices = @transform_18, window_bounds = array<i64: 1, 32>}, {pipeline_mode = #tpu.pipeline_mode<synchronous>, transform_indices = @transform_19, window_bounds = array<i64: 1, 32>}, {transform_indices = @transform_20, window_bounds = array<i64: 1, 8, 32>}, {transform_indices = @transform_21, window_bounds = array<i64: 1, 1, 8, 8>}]} {
    %c0_i32 = arith.constant 0 : i32
    %0 = arith.cmpi eq, %arg1, %c0_i32 : i32
    %1 = arith.extui %0 : i1 to i32
    %c0_i32_0 = arith.constant 0 : i32
    %2 = arith.cmpi ne, %1, %c0_i32_0 : i32
    scf.if %2 {
      %c0_106 = arith.constant 0 : index
      %c0_107 = arith.constant 0 : index
      %c0_108 = arith.constant 0 : index
      %235 = vector.load %arg2[%c0_106, %c0_107, %c0_108] : memref<1x8x32xf32, #tpu.memory_space<vmem>>, vector<1x8x32xf32>
      %236 = vector.shape_cast %235 : vector<1x8x32xf32> to vector<8x32xf32>
      %c0_109 = arith.constant 0 : index
      %c0_110 = arith.constant 0 : index
      %237 = vector.load %arg24[%c0_109, %c0_110] : memref<8x32xf32, #tpu.memory_space<vmem>>, vector<8x32xf32>
      tpu.vector_store %arg24[%c0_109, %c0_110], %236 {strides = array<i32>} : memref<8x32xf32, #tpu.memory_space<vmem>>, vector<8x32xf32>,
    } else {
    }
    %c0 = arith.constant 0 : index
    %c0_1 = arith.constant 0 : index
    %3 = vector.load %arg24[%c0, %c0_1] : memref<8x32xf32, #tpu.memory_space<vmem>>, vector<8x32xf32>
    %c0_2 = arith.constant 0 : index
    %c0_3 = arith.constant 0 : index
    %c0_4 = arith.constant 0 : index
    %4 = vector.load %arg3[%c0_2, %c0_3, %c0_4] : memref<1x8x1xf32, #tpu.memory_space<vmem>>, vector<1x8x1xf32>
    %5 = vector.shape_cast %4 : vector<1x8x1xf32> to vector<8x1xf32>
    %c0_5 = arith.constant 0 : index
    %c0_6 = arith.constant 0 : index
    %c0_7 = arith.constant 0 : index
    %6 = vector.load %arg4[%c0_5, %c0_6, %c0_7] : memref<1x1x32xf32, #tpu.memory_space<vmem>>, vector<1x1x32xf32>
    %7 = vector.shape_cast %6 : vector<1x1x32xf32> to vector<1x32xf32>
    %c0_8 = arith.constant 0 : index
    %c0_9 = arith.constant 0 : index
    %c0_10 = arith.constant 0 : index
    %8 = vector.load %arg5[%c0_8, %c0_9, %c0_10] : memref<1x1x32xf32, #tpu.memory_space<vmem>>, vector<1x1x32xf32>
    %9 = vector.shape_cast %8 : vector<1x1x32xf32> to vector<1x32xf32>
    %cst = arith.constant dense<0.000000e+00> : vector<8xf32>
    %10 = vector.multi_reduction <add>, %3, %cst [1] : vector<8x32xf32> to vector<8xf32>
    %11 = vector.shape_cast %10 : vector<8xf32> to vector<8x1xf32>
    %cst_11 = arith.constant 3.200000e+01 : f32
    %12 = vector.broadcast %cst_11 : f32 to vector<8x1xf32>
    %13 = arith.divf %11, %12 : vector<8x1xf32>
    %14 = vector.broadcast %13 : vector<8x1xf32> to vector<8x32xf32>
    %15 = arith.subf %3, %14 : vector<8x32xf32>
    %16 = arith.mulf %15, %15 : vector<8x32xf32>
    %cst_12 = arith.constant dense<0.000000e+00> : vector<8xf32>
    %17 = vector.multi_reduction <add>, %16, %cst_12 [1] : vector<8x32xf32> to vector<8xf32>
    %18 = vector.shape_cast %17 : vector<8xf32> to vector<8x1xf32>
    %cst_13 = arith.constant 3.200000e+01 : f32
    %19 = vector.broadcast %cst_13 : f32 to vector<8x1xf32>
    %20 = arith.divf %18, %19 : vector<8x1xf32>
    %21 = vector.broadcast %13 : vector<8x1xf32> to vector<8x32xf32>
    %22 = arith.subf %3, %21 : vector<8x32xf32>
    %cst_14 = arith.constant 9.99999974E-6 : f32
    %23 = vector.broadcast %cst_14 : f32 to vector<8x1xf32>
    %24 = arith.addf %20, %23 : vector<8x1xf32>
    %25 = math.rsqrt %24 : vector<8x1xf32>
    %26 = vector.broadcast %25 : vector<8x1xf32> to vector<8x32xf32>
    %27 = arith.mulf %22, %26 : vector<8x32xf32>
    %28 = vector.broadcast %7 : vector<1x32xf32> to vector<8x32xf32>
    %29 = arith.mulf %27, %28 : vector<8x32xf32>
    %30 = vector.broadcast %9 : vector<1x32xf32> to vector<8x32xf32>
    %31 = arith.addf %29, %30 : vector<8x32xf32>
    %32 = arith.truncf %31 : vector<8x32xf32> to vector<8x32xbf16>
    %c0_15 = arith.constant 0 : index
    %c0_16 = arith.constant 0 : index
    %c0_17 = arith.constant 0 : index
    %33 = vector.load %arg8[%c0_15, %c0_16, %c0_17] : memref<1x32x32xbf16, #tpu.memory_space<vmem>>, vector<1x32x32xbf16>
    %34 = vector.shape_cast %33 : vector<1x32x32xbf16> to vector<32x32xbf16>
    %cst_18 = arith.constant dense<0.000000e+00> : vector<8x32xf32>
    %35 = tpu.matmul %32, %34, %cst_18 {dimension_numbers = #tpu.dot_dimension_numbers<[1], [0], [0], [1], [0, 0, 1, 1], [], []>} : vector<8x32xbf16>, vector<32x32xbf16>, vector<8x32xf32> -> vector<8x32xf32>
    %c0_19 = arith.constant 0 : index
    %c0_20 = arith.constant 0 : index
    %c0_21 = arith.constant 0 : index
    %36 = vector.load %arg9[%c0_19, %c0_20, %c0_21] : memref<1x1x32xf32, #tpu.memory_space<vmem>>, vector<1x1x32xf32>
    %37 = vector.shape_cast %36 : vector<1x1x32xf32> to vector<1x32xf32>
    %38 = vector.broadcast %37 : vector<1x32xf32> to vector<8x32xf32>
    %39 = arith.addf %35, %38 : vector<8x32xf32>
    %cst_22 = arith.constant 0.353553385 : f32
    %40 = vector.broadcast %cst_22 : f32 to vector<8x32xf32>
    %41 = arith.mulf %39, %40 : vector<8x32xf32>
    %c0_23 = arith.constant 0 : index
    %c0_24 = arith.constant 0 : index
    %c0_25 = arith.constant 0 : index
    %42 = vector.load %arg10[%c0_23, %c0_24, %c0_25] : memref<1x32x32xbf16, #tpu.memory_space<vmem>>, vector<1x32x32xbf16>
    %43 = vector.shape_cast %42 : vector<1x32x32xbf16> to vector<32x32xbf16>
    %cst_26 = arith.constant dense<0.000000e+00> : vector<8x32xf32>
    %44 = tpu.matmul %32, %43, %cst_26 {dimension_numbers = #tpu.dot_dimension_numbers<[1], [0], [0], [1], [0, 0, 1, 1], [], []>} : vector<8x32xbf16>, vector<32x32xbf16>, vector<8x32xf32> -> vector<8x32xf32>
    %c0_27 = arith.constant 0 : index
    %c0_28 = arith.constant 0 : index
    %c0_29 = arith.constant 0 : index
    %45 = vector.load %arg11[%c0_27, %c0_28, %c0_29] : memref<1x1x32xf32, #tpu.memory_space<vmem>>, vector<1x1x32xf32>
    %46 = vector.shape_cast %45 : vector<1x1x32xf32> to vector<1x32xf32>
    %47 = vector.broadcast %46 : vector<1x32xf32> to vector<8x32xf32>
    %48 = arith.addf %44, %47 : vector<8x32xf32>
    %c0_30 = arith.constant 0 : index
    %c0_31 = arith.constant 0 : index
    %c0_32 = arith.constant 0 : index
    %49 = vector.load %arg12[%c0_30, %c0_31, %c0_32] : memref<1x32x32xbf16, #tpu.memory_space<vmem>>, vector<1x32x32xbf16>
    %50 = vector.shape_cast %49 : vector<1x32x32xbf16> to vector<32x32xbf16>
    %cst_33 = arith.constant dense<0.000000e+00> : vector<8x32xf32>
    %51 = tpu.matmul %32, %50, %cst_33 {dimension_numbers = #tpu.dot_dimension_numbers<[1], [0], [0], [1], [0, 0, 1, 1], [], []>} : vector<8x32xbf16>, vector<32x32xbf16>, vector<8x32xf32> -> vector<8x32xf32>
    %c0_34 = arith.constant 0 : index
    %c0_35 = arith.constant 0 : index
    %c0_36 = arith.constant 0 : index
    %52 = vector.load %arg13[%c0_34, %c0_35, %c0_36] : memref<1x1x32xf32, #tpu.memory_space<vmem>>, vector<1x1x32xf32>
    %53 = vector.shape_cast %52 : vector<1x1x32xf32> to vector<1x32xf32>
    %54 = vector.broadcast %53 : vector<1x32xf32> to vector<8x32xf32>
    %55 = arith.addf %51, %54 : vector<8x32xf32>
    %56 = tpu.iota {dimensions = array<i32: 0>} : vector<8x8xi32>
    %57 = tpu.iota {dimensions = array<i32: 1>} : vector<8x8xi32>
    %58 = arith.cmpi sle, %57, %56 : vector<8x8xi32>
    %59 = vector.shape_cast %58 : vector<8x8xi1> to vector<1x8x8xi1>
    %cst_37 = arith.constant 0.000000e+00 : f32
    %60 = vector.broadcast %cst_37 : f32 to vector<1x8x8xf32>
    %61 = vector.extract_strided_slice %41 {offsets = [0, 0], sizes = [8, 8], strides = [1, 1]} : vector<8x32xf32> to vector<8x8xf32>
    %62 = vector.shape_cast %61 : vector<8x8xf32> to vector<1x8x8xf32>
    %63 = arith.truncf %62 : vector<1x8x8xf32> to vector<1x8x8xbf16>
    %64 = vector.extract_strided_slice %48 {offsets = [0, 0], sizes = [8, 8], strides = [1, 1]} : vector<8x32xf32> to vector<8x8xf32>
    %65 = vector.shape_cast %64 : vector<8x8xf32> to vector<1x8x8xf32>
    %66 = arith.truncf %65 : vector<1x8x8xf32> to vector<1x8x8xbf16>
    %67 = vector.extract_strided_slice %55 {offsets = [0, 0], sizes = [8, 8], strides = [1, 1]} : vector<8x32xf32> to vector<8x8xf32>
    %68 = vector.shape_cast %67 : vector<8x8xf32> to vector<1x8x8xf32>
    %69 = arith.truncf %68 : vector<1x8x8xf32> to vector<1x8x8xbf16>
    "tpu.trace_start"() <{level = 10 : i32, message = "bqd,bkd->bqk"}> : () -> ()
    %cst_38 = arith.constant dense<0.000000e+00> : vector<1x8x8xf32>
    %70 = tpu.matmul %63, %66, %cst_38 {dimension_numbers = #tpu.dot_dimension_numbers<[2], [2], [1], [1], [0, 0, 0, 1, 1, 1], [0], [0]>} : vector<1x8x8xbf16>, vector<1x8x8xbf16>, vector<1x8x8xf32> -> vector<1x8x8xf32>
    %cst_39 = arith.constant -1.000000e+30 : f32
    "tpu.trace_stop"() : () -> ()
    %71 = vector.broadcast %cst_39 : f32 to vector<1x8x8xf32>
    %72 = arith.select %59, %70, %71 : vector<1x8x8xi1>, vector<1x8x8xf32>
    %cst_40 = arith.constant dense<0xFF800000> : vector<1x8xf32>
    %73 = vector.multi_reduction <maximumf>, %72, %cst_40 [2] : vector<1x8x8xf32> to vector<1x8xf32>
    %74 = vector.shape_cast %73 : vector<1x8xf32> to vector<1x8x1xf32>
    %75 = vector.broadcast %74 : vector<1x8x1xf32> to vector<1x8x8xf32>
    %76 = arith.subf %72, %75 : vector<1x8x8xf32>
    %77 = math.exp %76 : vector<1x8x8xf32>
    %cst_41 = arith.constant dense<0.000000e+00> : vector<1x8xf32>
    %78 = vector.multi_reduction <add>, %77, %cst_41 [2] : vector<1x8x8xf32> to vector<1x8xf32>
    %79 = vector.shape_cast %78 : vector<1x8xf32> to vector<1x8x1xf32>
    %80 = tpu.reciprocal %79 {approx = true} : vector<1x8x1xf32> -> vector<1x8x1xf32>
    %81 = vector.broadcast %80 : vector<1x8x1xf32> to vector<1x8x8xf32>
    %82 = arith.mulf %77, %81 : vector<1x8x8xf32>
    %83 = arith.addf %60, %82 : vector<1x8x8xf32>
    %84 = arith.truncf %82 : vector<1x8x8xf32> to vector<1x8x8xbf16>
    "tpu.trace_start"() <{level = 10 : i32, message = "bqk,bkd->bqd"}> : () -> ()
    %cst_42 = arith.constant dense<0.000000e+00> : vector<1x8x8xf32>
    %85 = tpu.matmul %84, %69, %cst_42 {dimension_numbers = #tpu.dot_dimension_numbers<[2], [1], [1], [2], [0, 0, 0, 1, 1, 2], [0], [0]>} : vector<1x8x8xbf16>, vector<1x8x8xbf16>, vector<1x8x8xf32> -> vector<1x8x8xf32>
    "tpu.trace_stop"() : () -> ()
    %86 = vector.shape_cast %85 : vector<1x8x8xf32> to vector<8x8xf32>
    %c0_43 = arith.constant 0 : index
    %c0_44 = arith.constant 0 : index
    %87 = vector.load %arg25[%c0_43, %c0_44] : memref<8x32xf32, #tpu.memory_space<vmem>>, vector<8x8xf32>
    tpu.vector_store %arg25[%c0_43, %c0_44], %86 {strides = array<i32>} : memref<8x32xf32, #tpu.memory_space<vmem>>, vector<8x8xf32>,
    %88 = vector.extract_strided_slice %41 {offsets = [0, 8], sizes = [8, 8], strides = [1, 1]} : vector<8x32xf32> to vector<8x8xf32>
    %89 = vector.shape_cast %88 : vector<8x8xf32> to vector<1x8x8xf32>
    %90 = arith.truncf %89 : vector<1x8x8xf32> to vector<1x8x8xbf16>
    %91 = vector.extract_strided_slice %48 {offsets = [0, 8], sizes = [8, 8], strides = [1, 1]} : vector<8x32xf32> to vector<8x8xf32>
    %92 = vector.shape_cast %91 : vector<8x8xf32> to vector<1x8x8xf32>
    %93 = arith.truncf %92 : vector<1x8x8xf32> to vector<1x8x8xbf16>
    %94 = vector.extract_strided_slice %55 {offsets = [0, 8], sizes = [8, 8], strides = [1, 1]} : vector<8x32xf32> to vector<8x8xf32>
    %95 = vector.shape_cast %94 : vector<8x8xf32> to vector<1x8x8xf32>
    %96 = arith.truncf %95 : vector<1x8x8xf32> to vector<1x8x8xbf16>
    "tpu.trace_start"() <{level = 10 : i32, message = "bqd,bkd->bqk"}> : () -> ()
    %cst_45 = arith.constant dense<0.000000e+00> : vector<1x8x8xf32>
    %97 = tpu.matmul %90, %93, %cst_45 {dimension_numbers = #tpu.dot_dimension_numbers<[2], [2], [1], [1], [0, 0, 0, 1, 1, 1], [0], [0]>} : vector<1x8x8xbf16>, vector<1x8x8xbf16>, vector<1x8x8xf32> -> vector<1x8x8xf32>
    %cst_46 = arith.constant -1.000000e+30 : f32
    "tpu.trace_stop"() : () -> ()
    %98 = vector.broadcast %cst_46 : f32 to vector<1x8x8xf32>
    %99 = arith.select %59, %97, %98 : vector<1x8x8xi1>, vector<1x8x8xf32>
    %cst_47 = arith.constant dense<0xFF800000> : vector<1x8xf32>
    %100 = vector.multi_reduction <maximumf>, %99, %cst_47 [2] : vector<1x8x8xf32> to vector<1x8xf32>
    %101 = vector.shape_cast %100 : vector<1x8xf32> to vector<1x8x1xf32>
    %102 = vector.broadcast %101 : vector<1x8x1xf32> to vector<1x8x8xf32>
    %103 = arith.subf %99, %102 : vector<1x8x8xf32>
    %104 = math.exp %103 : vector<1x8x8xf32>
    %cst_48 = arith.constant dense<0.000000e+00> : vector<1x8xf32>
    %105 = vector.multi_reduction <add>, %104, %cst_48 [2] : vector<1x8x8xf32> to vector<1x8xf32>
    %106 = vector.shape_cast %105 : vector<1x8xf32> to vector<1x8x1xf32>
    %107 = tpu.reciprocal %106 {approx = true} : vector<1x8x1xf32> -> vector<1x8x1xf32>
    %108 = vector.broadcast %107 : vector<1x8x1xf32> to vector<1x8x8xf32>
    %109 = arith.mulf %104, %108 : vector<1x8x8xf32>
    %110 = arith.addf %83, %109 : vector<1x8x8xf32>
    %111 = arith.truncf %109 : vector<1x8x8xf32> to vector<1x8x8xbf16>
    "tpu.trace_start"() <{level = 10 : i32, message = "bqk,bkd->bqd"}> : () -> ()
    %cst_49 = arith.constant dense<0.000000e+00> : vector<1x8x8xf32>
    %112 = tpu.matmul %111, %96, %cst_49 {dimension_numbers = #tpu.dot_dimension_numbers<[2], [1], [1], [2], [0, 0, 0, 1, 1, 2], [0], [0]>} : vector<1x8x8xbf16>, vector<1x8x8xbf16>, vector<1x8x8xf32> -> vector<1x8x8xf32>
    "tpu.trace_stop"() : () -> ()
    %113 = vector.shape_cast %112 : vector<1x8x8xf32> to vector<8x8xf32>
    %c0_50 = arith.constant 0 : index
    %c8 = arith.constant 8 : index
    %114 = vector.load %arg25[%c0_50, %c8] : memref<8x32xf32, #tpu.memory_space<vmem>>, vector<8x8xf32>
    tpu.vector_store %arg25[%c0_50, %c8], %113 {strides = array<i32>} : memref<8x32xf32, #tpu.memory_space<vmem>>, vector<8x8xf32>,
    %115 = vector.extract_strided_slice %41 {offsets = [0, 16], sizes = [8, 8], strides = [1, 1]} : vector<8x32xf32> to vector<8x8xf32>
    %116 = vector.shape_cast %115 : vector<8x8xf32> to vector<1x8x8xf32>
    %117 = arith.truncf %116 : vector<1x8x8xf32> to vector<1x8x8xbf16>
    %118 = vector.extract_strided_slice %48 {offsets = [0, 16], sizes = [8, 8], strides = [1, 1]} : vector<8x32xf32> to vector<8x8xf32>
    %119 = vector.shape_cast %118 : vector<8x8xf32> to vector<1x8x8xf32>
    %120 = arith.truncf %119 : vector<1x8x8xf32> to vector<1x8x8xbf16>
    %121 = vector.extract_strided_slice %55 {offsets = [0, 16], sizes = [8, 8], strides = [1, 1]} : vector<8x32xf32> to vector<8x8xf32>
    %122 = vector.shape_cast %121 : vector<8x8xf32> to vector<1x8x8xf32>
    %123 = arith.truncf %122 : vector<1x8x8xf32> to vector<1x8x8xbf16>
    "tpu.trace_start"() <{level = 10 : i32, message = "bqd,bkd->bqk"}> : () -> ()
    %cst_51 = arith.constant dense<0.000000e+00> : vector<1x8x8xf32>
    %124 = tpu.matmul %117, %120, %cst_51 {dimension_numbers = #tpu.dot_dimension_numbers<[2], [2], [1], [1], [0, 0, 0, 1, 1, 1], [0], [0]>} : vector<1x8x8xbf16>, vector<1x8x8xbf16>, vector<1x8x8xf32> -> vector<1x8x8xf32>
    %cst_52 = arith.constant -1.000000e+30 : f32
    "tpu.trace_stop"() : () -> ()
    %125 = vector.broadcast %cst_52 : f32 to vector<1x8x8xf32>
    %126 = arith.select %59, %124, %125 : vector<1x8x8xi1>, vector<1x8x8xf32>
    %cst_53 = arith.constant dense<0xFF800000> : vector<1x8xf32>
    %127 = vector.multi_reduction <maximumf>, %126, %cst_53 [2] : vector<1x8x8xf32> to vector<1x8xf32>
    %128 = vector.shape_cast %127 : vector<1x8xf32> to vector<1x8x1xf32>
    %129 = vector.broadcast %128 : vector<1x8x1xf32> to vector<1x8x8xf32>
    %130 = arith.subf %126, %129 : vector<1x8x8xf32>
    %131 = math.exp %130 : vector<1x8x8xf32>
    %cst_54 = arith.constant dense<0.000000e+00> : vector<1x8xf32>
    %132 = vector.multi_reduction <add>, %131, %cst_54 [2] : vector<1x8x8xf32> to vector<1x8xf32>
    %133 = vector.shape_cast %132 : vector<1x8xf32> to vector<1x8x1xf32>
    %134 = tpu.reciprocal %133 {approx = true} : vector<1x8x1xf32> -> vector<1x8x1xf32>
    %135 = vector.broadcast %134 : vector<1x8x1xf32> to vector<1x8x8xf32>
    %136 = arith.mulf %131, %135 : vector<1x8x8xf32>
    %137 = arith.addf %110, %136 : vector<1x8x8xf32>
    %138 = arith.truncf %136 : vector<1x8x8xf32> to vector<1x8x8xbf16>
    "tpu.trace_start"() <{level = 10 : i32, message = "bqk,bkd->bqd"}> : () -> ()
    %cst_55 = arith.constant dense<0.000000e+00> : vector<1x8x8xf32>
    %139 = tpu.matmul %138, %123, %cst_55 {dimension_numbers = #tpu.dot_dimension_numbers<[2], [1], [1], [2], [0, 0, 0, 1, 1, 2], [0], [0]>} : vector<1x8x8xbf16>, vector<1x8x8xbf16>, vector<1x8x8xf32> -> vector<1x8x8xf32>
    "tpu.trace_stop"() : () -> ()
    %140 = vector.shape_cast %139 : vector<1x8x8xf32> to vector<8x8xf32>
    %c0_56 = arith.constant 0 : index
    %c16 = arith.constant 16 : index
    %141 = vector.load %arg25[%c0_56, %c16] : memref<8x32xf32, #tpu.memory_space<vmem>>, vector<8x8xf32>
    tpu.vector_store %arg25[%c0_56, %c16], %140 {strides = array<i32>} : memref<8x32xf32, #tpu.memory_space<vmem>>, vector<8x8xf32>,
    %142 = vector.extract_strided_slice %41 {offsets = [0, 24], sizes = [8, 8], strides = [1, 1]} : vector<8x32xf32> to vector<8x8xf32>
    %143 = vector.shape_cast %142 : vector<8x8xf32> to vector<1x8x8xf32>
    %144 = arith.truncf %143 : vector<1x8x8xf32> to vector<1x8x8xbf16>
    %145 = vector.extract_strided_slice %48 {offsets = [0, 24], sizes = [8, 8], strides = [1, 1]} : vector<8x32xf32> to vector<8x8xf32>
    %146 = vector.shape_cast %145 : vector<8x8xf32> to vector<1x8x8xf32>
    %147 = arith.truncf %146 : vector<1x8x8xf32> to vector<1x8x8xbf16>
    %148 = vector.extract_strided_slice %55 {offsets = [0, 24], sizes = [8, 8], strides = [1, 1]} : vector<8x32xf32> to vector<8x8xf32>
    %149 = vector.shape_cast %148 : vector<8x8xf32> to vector<1x8x8xf32>
    %150 = arith.truncf %149 : vector<1x8x8xf32> to vector<1x8x8xbf16>
    "tpu.trace_start"() <{level = 10 : i32, message = "bqd,bkd->bqk"}> : () -> ()
    %cst_57 = arith.constant dense<0.000000e+00> : vector<1x8x8xf32>
    %151 = tpu.matmul %144, %147, %cst_57 {dimension_numbers = #tpu.dot_dimension_numbers<[2], [2], [1], [1], [0, 0, 0, 1, 1, 1], [0], [0]>} : vector<1x8x8xbf16>, vector<1x8x8xbf16>, vector<1x8x8xf32> -> vector<1x8x8xf32>
    %cst_58 = arith.constant -1.000000e+30 : f32
    "tpu.trace_stop"() : () -> ()
    %152 = vector.broadcast %cst_58 : f32 to vector<1x8x8xf32>
    %153 = arith.select %59, %151, %152 : vector<1x8x8xi1>, vector<1x8x8xf32>
    %cst_59 = arith.constant dense<0xFF800000> : vector<1x8xf32>
    %154 = vector.multi_reduction <maximumf>, %153, %cst_59 [2] : vector<1x8x8xf32> to vector<1x8xf32>
    %155 = vector.shape_cast %154 : vector<1x8xf32> to vector<1x8x1xf32>
    %156 = vector.broadcast %155 : vector<1x8x1xf32> to vector<1x8x8xf32>
    %157 = arith.subf %153, %156 : vector<1x8x8xf32>
    %158 = math.exp %157 : vector<1x8x8xf32>
    %cst_60 = arith.constant dense<0.000000e+00> : vector<1x8xf32>
    %159 = vector.multi_reduction <add>, %158, %cst_60 [2] : vector<1x8x8xf32> to vector<1x8xf32>
    %160 = vector.shape_cast %159 : vector<1x8xf32> to vector<1x8x1xf32>
    %161 = tpu.reciprocal %160 {approx = true} : vector<1x8x1xf32> -> vector<1x8x1xf32>
    %162 = vector.broadcast %161 : vector<1x8x1xf32> to vector<1x8x8xf32>
    %163 = arith.mulf %158, %162 : vector<1x8x8xf32>
    %164 = arith.addf %137, %163 : vector<1x8x8xf32>
    %165 = arith.truncf %163 : vector<1x8x8xf32> to vector<1x8x8xbf16>
    "tpu.trace_start"() <{level = 10 : i32, message = "bqk,bkd->bqd"}> : () -> ()
    %cst_61 = arith.constant dense<0.000000e+00> : vector<1x8x8xf32>
    %166 = tpu.matmul %165, %150, %cst_61 {dimension_numbers = #tpu.dot_dimension_numbers<[2], [1], [1], [2], [0, 0, 0, 1, 1, 2], [0], [0]>} : vector<1x8x8xbf16>, vector<1x8x8xbf16>, vector<1x8x8xf32> -> vector<1x8x8xf32>
    "tpu.trace_stop"() : () -> ()
    %167 = vector.shape_cast %166 : vector<1x8x8xf32> to vector<8x8xf32>
    %c0_62 = arith.constant 0 : index
    %c24 = arith.constant 24 : index
    %168 = vector.load %arg25[%c0_62, %c24] : memref<8x32xf32, #tpu.memory_space<vmem>>, vector<8x8xf32>
    tpu.vector_store %arg25[%c0_62, %c24], %167 {strides = array<i32>} : memref<8x32xf32, #tpu.memory_space<vmem>>, vector<8x8xf32>,
    %cst_63 = arith.constant 2.500000e-01 : f32
    %169 = vector.broadcast %cst_63 : f32 to vector<1x8x8xf32>
    %170 = arith.mulf %164, %169 : vector<1x8x8xf32>
    %c0_64 = arith.constant 0 : index
    %c0_65 = arith.constant 0 : index
    %c0_66 = arith.constant 0 : index
    %c0_67 = arith.constant 0 : index
    %171 = vector.load %arg23[%c0_64, %c0_65, %c0_66, %c0_67] : memref<1x1x8x8xf32, #tpu.memory_space<vmem>>, vector<1x1x8x8xf32>
    %172 = vector.shape_cast %171 : vector<1x1x8x8xf32> to vector<1x8x8xf32>
    %173 = vector.shape_cast %170 : vector<1x8x8xf32> to vector<1x1x8x8xf32>
    tpu.vector_store %arg23[%c0_64, %c0_65, %c0_66, %c0_67], %173 {strides = array<i32>} : memref<1x1x8x8xf32, #tpu.memory_space<vmem>>, vector<1x1x8x8xf32>,
    %c0_68 = arith.constant 0 : index
    %c0_69 = arith.constant 0 : index
    %174 = vector.load %arg25[%c0_68, %c0_69] : memref<8x32xf32, #tpu.memory_space<vmem>>, vector<8x32xf32>
    %175 = arith.truncf %174 : vector<8x32xf32> to vector<8x32xbf16>
    %c0_70 = arith.constant 0 : index
    %c0_71 = arith.constant 0 : index
    %c0_72 = arith.constant 0 : index
    %176 = vector.load %arg14[%c0_70, %c0_71, %c0_72] : memref<1x32x32xbf16, #tpu.memory_space<vmem>>, vector<1x32x32xbf16>
    %177 = vector.shape_cast %176 : vector<1x32x32xbf16> to vector<32x32xbf16>
    %cst_73 = arith.constant dense<0.000000e+00> : vector<8x32xf32>
    %178 = tpu.matmul %175, %177, %cst_73 {dimension_numbers = #tpu.dot_dimension_numbers<[1], [0], [0], [1], [0, 0, 1, 1], [], []>} : vector<8x32xbf16>, vector<32x32xbf16>, vector<8x32xf32> -> vector<8x32xf32>
    %c0_74 = arith.constant 0 : index
    %c0_75 = arith.constant 0 : index
    %c0_76 = arith.constant 0 : index
    %179 = vector.load %arg15[%c0_74, %c0_75, %c0_76] : memref<1x1x32xf32, #tpu.memory_space<vmem>>, vector<1x1x32xf32>
    %180 = vector.shape_cast %179 : vector<1x1x32xf32> to vector<1x32xf32>
    %181 = vector.broadcast %180 : vector<1x32xf32> to vector<8x32xf32>
    %182 = arith.addf %178, %181 : vector<8x32xf32>
    %183 = arith.addf %3, %182 : vector<8x32xf32>
    %c0_77 = arith.constant 0 : index
    %c0_78 = arith.constant 0 : index
    %c0_79 = arith.constant 0 : index
    %184 = vector.load %arg6[%c0_77, %c0_78, %c0_79] : memref<1x1x32xf32, #tpu.memory_space<vmem>>, vector<1x1x32xf32>
    %185 = vector.shape_cast %184 : vector<1x1x32xf32> to vector<1x32xf32>
    %c0_80 = arith.constant 0 : index
    %c0_81 = arith.constant 0 : index
    %c0_82 = arith.constant 0 : index
    %186 = vector.load %arg7[%c0_80, %c0_81, %c0_82] : memref<1x1x32xf32, #tpu.memory_space<vmem>>, vector<1x1x32xf32>
    %187 = vector.shape_cast %186 : vector<1x1x32xf32> to vector<1x32xf32>
    %cst_83 = arith.constant dense<0.000000e+00> : vector<8xf32>
    %188 = vector.multi_reduction <add>, %183, %cst_83 [1] : vector<8x32xf32> to vector<8xf32>
    %189 = vector.shape_cast %188 : vector<8xf32> to vector<8x1xf32>
    %cst_84 = arith.constant 3.200000e+01 : f32
    %190 = vector.broadcast %cst_84 : f32 to vector<8x1xf32>
    %191 = arith.divf %189, %190 : vector<8x1xf32>
    %192 = vector.broadcast %191 : vector<8x1xf32> to vector<8x32xf32>
    %193 = arith.subf %183, %192 : vector<8x32xf32>
    %194 = arith.mulf %193, %193 : vector<8x32xf32>
    %cst_85 = arith.constant dense<0.000000e+00> : vector<8xf32>
    %195 = vector.multi_reduction <add>, %194, %cst_85 [1] : vector<8x32xf32> to vector<8xf32>
    %196 = vector.shape_cast %195 : vector<8xf32> to vector<8x1xf32>
    %cst_86 = arith.constant 3.200000e+01 : f32
    %197 = vector.broadcast %cst_86 : f32 to vector<8x1xf32>
    %198 = arith.divf %196, %197 : vector<8x1xf32>
    %199 = vector.broadcast %191 : vector<8x1xf32> to vector<8x32xf32>
    %200 = arith.subf %183, %199 : vector<8x32xf32>
    %cst_87 = arith.constant 9.99999974E-6 : f32
    %201 = vector.broadcast %cst_87 : f32 to vector<8x1xf32>
    %202 = arith.addf %198, %201 : vector<8x1xf32>
    %203 = math.rsqrt %202 : vector<8x1xf32>
    %204 = vector.broadcast %203 : vector<8x1xf32> to vector<8x32xf32>
    %205 = arith.mulf %200, %204 : vector<8x32xf32>
    %206 = vector.broadcast %185 : vector<1x32xf32> to vector<8x32xf32>
    %207 = arith.mulf %205, %206 : vector<8x32xf32>
    %208 = vector.broadcast %187 : vector<1x32xf32> to vector<8x32xf32>
    %209 = arith.addf %207, %208 : vector<8x32xf32>
    %210 = arith.truncf %209 : vector<8x32xf32> to vector<8x32xbf16>
    %c0_88 = arith.constant 0 : index
    %c0_89 = arith.constant 0 : index
    %c0_90 = arith.constant 0 : index
    %211 = vector.load %arg16[%c0_88, %c0_89, %c0_90] : memref<1x32x32xbf16, #tpu.memory_space<vmem>>, vector<1x32x32xbf16>
    %212 = vector.shape_cast %211 : vector<1x32x32xbf16> to vector<32x32xbf16>
    %cst_91 = arith.constant dense<0.000000e+00> : vector<8x32xf32>
    %213 = tpu.matmul %210, %212, %cst_91 {dimension_numbers = #tpu.dot_dimension_numbers<[1], [0], [0], [1], [0, 0, 1, 1], [], []>} : vector<8x32xbf16>, vector<32x32xbf16>, vector<8x32xf32> -> vector<8x32xf32>
    %c0_92 = arith.constant 0 : index
    %c0_93 = arith.constant 0 : index
    %c0_94 = arith.constant 0 : index
    %214 = vector.load %arg17[%c0_92, %c0_93, %c0_94] : memref<1x1x32xf32, #tpu.memory_space<vmem>>, vector<1x1x32xf32>
    %215 = vector.shape_cast %214 : vector<1x1x32xf32> to vector<1x32xf32>
    %216 = vector.broadcast %215 : vector<1x32xf32> to vector<8x32xf32>
    %217 = arith.addf %213, %216 : vector<8x32xf32>
    %cst_95 = arith.constant 0.000000e+00 : f32
    %218 = vector.broadcast %cst_95 : f32 to vector<8x32xf32>
    %219 = arith.maximumf %217, %218 : vector<8x32xf32>
    %220 = arith.truncf %219 : vector<8x32xf32> to vector<8x32xbf16>
    %c0_96 = arith.constant 0 : index
    %c0_97 = arith.constant 0 : index
    %c0_98 = arith.constant 0 : index
    %221 = vector.load %arg18[%c0_96, %c0_97, %c0_98] : memref<1x32x32xbf16, #tpu.memory_space<vmem>>, vector<1x32x32xbf16>
    %222 = vector.shape_cast %221 : vector<1x32x32xbf16> to vector<32x32xbf16>
    %cst_99 = arith.constant dense<0.000000e+00> : vector<8x32xf32>
    %223 = tpu.matmul %220, %222, %cst_99 {dimension_numbers = #tpu.dot_dimension_numbers<[1], [0], [0], [1], [0, 0, 1, 1], [], []>} : vector<8x32xbf16>, vector<32x32xbf16>, vector<8x32xf32> -> vector<8x32xf32>
    %c0_100 = arith.constant 0 : index
    %c0_101 = arith.constant 0 : index
    %c0_102 = arith.constant 0 : index
    %224 = vector.load %arg19[%c0_100, %c0_101, %c0_102] : memref<1x1x32xf32, #tpu.memory_space<vmem>>, vector<1x1x32xf32>
    %225 = vector.shape_cast %224 : vector<1x1x32xf32> to vector<1x32xf32>
    %226 = vector.broadcast %225 : vector<1x32xf32> to vector<8x32xf32>
    %227 = arith.addf %223, %226 : vector<8x32xf32>
    %228 = arith.addf %183, %227 : vector<8x32xf32>
    %229 = vector.broadcast %5 : vector<8x1xf32> to vector<8x32xf32>
    %230 = arith.mulf %228, %229 : vector<8x32xf32>
    %c0_103 = arith.constant 0 : index
    %c0_104 = arith.constant 0 : index
    %231 = vector.load %arg24[%c0_103, %c0_104] : memref<8x32xf32, #tpu.memory_space<vmem>>, vector<8x32xf32>
    tpu.vector_store %arg24[%c0_103, %c0_104], %230 {strides = array<i32>} : memref<8x32xf32, #tpu.memory_space<vmem>>, vector<8x32xf32>,
    %c2_i32 = arith.constant 2 : i32
    %232 = arith.cmpi eq, %arg1, %c2_i32 : i32
    %233 = arith.extui %232 : i1 to i32
    %c0_i32_105 = arith.constant 0 : i32
    %234 = arith.cmpi ne, %233, %c0_i32_105 : i32
    scf.if %234 {
      %c0_106 = arith.constant 0 : index
      %c0_107 = arith.constant 0 : index
      %235 = vector.load %arg20[%c0_106, %c0_107] : memref<1x32xf32, #tpu.memory_space<vmem>>, vector<1x32xf32>
      %c0_108 = arith.constant 0 : index
      %c0_109 = arith.constant 0 : index
      %236 = vector.load %arg21[%c0_108, %c0_109] : memref<1x32xf32, #tpu.memory_space<vmem>>, vector<1x32xf32>
      %cst_110 = arith.constant dense<0.000000e+00> : vector<8xf32>
      %237 = vector.multi_reduction <add>, %230, %cst_110 [1] : vector<8x32xf32> to vector<8xf32>
      %238 = vector.shape_cast %237 : vector<8xf32> to vector<8x1xf32>
      %cst_111 = arith.constant 3.200000e+01 : f32
      %239 = vector.broadcast %cst_111 : f32 to vector<8x1xf32>
      %240 = arith.divf %238, %239 : vector<8x1xf32>
      %241 = vector.broadcast %240 : vector<8x1xf32> to vector<8x32xf32>
      %242 = arith.subf %230, %241 : vector<8x32xf32>
      %243 = arith.mulf %242, %242 : vector<8x32xf32>
      %cst_112 = arith.constant dense<0.000000e+00> : vector<8xf32>
      %244 = vector.multi_reduction <add>, %243, %cst_112 [1] : vector<8x32xf32> to vector<8xf32>
      %245 = vector.shape_cast %244 : vector<8xf32> to vector<8x1xf32>
      %cst_113 = arith.constant 3.200000e+01 : f32
      %246 = vector.broadcast %cst_113 : f32 to vector<8x1xf32>
      %247 = arith.divf %245, %246 : vector<8x1xf32>
      %248 = vector.broadcast %240 : vector<8x1xf32> to vector<8x32xf32>
      %249 = arith.subf %230, %248 : vector<8x32xf32>
      %cst_114 = arith.constant 9.99999974E-6 : f32
      %250 = vector.broadcast %cst_114 : f32 to vector<8x1xf32>
      %251 = arith.addf %247, %250 : vector<8x1xf32>
      %252 = math.rsqrt %251 : vector<8x1xf32>
      %253 = vector.broadcast %252 : vector<8x1xf32> to vector<8x32xf32>
      %254 = arith.mulf %249, %253 : vector<8x32xf32>
      %255 = vector.broadcast %235 : vector<1x32xf32> to vector<8x32xf32>
      %256 = arith.mulf %254, %255 : vector<8x32xf32>
      %257 = vector.broadcast %236 : vector<1x32xf32> to vector<8x32xf32>
      %258 = arith.addf %256, %257 : vector<8x32xf32>
      %259 = vector.shape_cast %258 : vector<8x32xf32> to vector<1x8x32xf32>
      %c0_115 = arith.constant 0 : index
      %c0_116 = arith.constant 0 : index
      %c0_117 = arith.constant 0 : index
      %260 = vector.load %arg22[%c0_115, %c0_116, %c0_117] : memref<1x8x32xf32, #tpu.memory_space<vmem>>, vector<1x8x32xf32>
      tpu.vector_store %arg22[%c0_115, %c0_116, %c0_117], %259 {strides = array<i32>} : memref<1x8x32xf32, #tpu.memory_space<vmem>>, vector<1x8x32xf32>,
    } else {
    }
    return
  }
  func.func @transform_0(%arg0: i32, %arg1: i32) -> (i32, i32, i32) {
    %c0_i32 = arith.constant 0 : i32
    %c0_i32_0 = arith.constant 0 : i32
    %c0_i32_1 = arith.constant 0 : i32
    return %arg0, %c0_i32, %c0_i32_0 : i32, i32, i32
  }
  func.func @transform_1(%arg0: i32, %arg1: i32) -> (i32, i32, i32) {
    %c0_i32 = arith.constant 0 : i32
    %c0_i32_0 = arith.constant 0 : i32
    %c0_i32_1 = arith.constant 0 : i32
    return %arg0, %c0_i32, %c0_i32_0 : i32, i32, i32
  }
  func.func @transform_2(%arg0: i32, %arg1: i32) -> (i32, i32, i32) {
    %c0_i32 = arith.constant 0 : i32
    %c0_i32_0 = arith.constant 0 : i32
    %c0_i32_1 = arith.constant 0 : i32
    return %arg1, %c0_i32, %c0_i32_0 : i32, i32, i32
  }
  func.func @transform_3(%arg0: i32, %arg1: i32) -> (i32, i32, i32) {
    %c0_i32 = arith.constant 0 : i32
    %c0_i32_0 = arith.constant 0 : i32
    %c0_i32_1 = arith.constant 0 : i32
    return %arg1, %c0_i32, %c0_i32_0 : i32, i32, i32
  }
  func.func @transform_4(%arg0: i32, %arg1: i32) -> (i32, i32, i32) {
    %c0_i32 = arith.constant 0 : i32
    %c0_i32_0 = arith.constant 0 : i32
    %c0_i32_1 = arith.constant 0 : i32
    return %arg1, %c0_i32, %c0_i32_0 : i32, i32, i32
  }
  func.func @transform_5(%arg0: i32, %arg1: i32) -> (i32, i32, i32) {
    %c0_i32 = arith.constant 0 : i32
    %c0_i32_0 = arith.constant 0 : i32
    %c0_i32_1 = arith.constant 0 : i32
    return %arg1, %c0_i32, %c0_i32_0 : i32, i32, i32
  }
  func.func @transform_6(%arg0: i32, %arg1: i32) -> (i32, i32, i32) {
    %c0_i32 = arith.constant 0 : i32
    %c0_i32_0 = arith.constant 0 : i32
    %c0_i32_1 = arith.constant 0 : i32
    return %arg1, %c0_i32, %c0_i32_0 : i32, i32, i32
  }
  func.func @transform_7(%arg0: i32, %arg1: i32) -> (i32, i32, i32) {
    %c0_i32 = arith.constant 0 : i32
    %c0_i32_0 = arith.constant 0 : i32
    %c0_i32_1 = arith.constant 0 : i32
    return %arg1, %c0_i32, %c0_i32_0 : i32, i32, i32
  }
  func.func @transform_8(%arg0: i32, %arg1: i32) -> (i32, i32, i32) {
    %c0_i32 = arith.constant 0 : i32
    %c0_i32_0 = arith.constant 0 : i32
    %c0_i32_1 = arith.constant 0 : i32
    return %arg1, %c0_i32, %c0_i32_0 : i32, i32, i32
  }
  func.func @transform_9(%arg0: i32, %arg1: i32) -> (i32, i32, i32) {
    %c0_i32 = arith.constant 0 : i32
    %c0_i32_0 = arith.constant 0 : i32
    %c0_i32_1 = arith.constant 0 : i32
    return %arg1, %c0_i32, %c0_i32_0 : i32, i32, i32
  }
  func.func @transform_10(%arg0: i32, %arg1: i32) -> (i32, i32, i32) {
    %c0_i32 = arith.constant 0 : i32
    %c0_i32_0 = arith.constant 0 : i32
    %c0_i32_1 = arith.constant 0 : i32
    return %arg1, %c0_i32, %c0_i32_0 : i32, i32, i32
  }
  func.func @transform_11(%arg0: i32, %arg1: i32) -> (i32, i32, i32) {
    %c0_i32 = arith.constant 0 : i32
    %c0_i32_0 = arith.constant 0 : i32
    %c0_i32_1 = arith.constant 0 : i32
    return %arg1, %c0_i32, %c0_i32_0 : i32, i32, i32
  }
  func.func @transform_12(%arg0: i32, %arg1: i32) -> (i32, i32, i32) {
    %c0_i32 = arith.constant 0 : i32
    %c0_i32_0 = arith.constant 0 : i32
    %c0_i32_1 = arith.constant 0 : i32
    return %arg1, %c0_i32, %c0_i32_0 : i32, i32, i32
  }
  func.func @transform_13(%arg0: i32, %arg1: i32) -> (i32, i32, i32) {
    %c0_i32 = arith.constant 0 : i32
    %c0_i32_0 = arith.constant 0 : i32
    %c0_i32_1 = arith.constant 0 : i32
    return %arg1, %c0_i32, %c0_i32_0 : i32, i32, i32
  }
  func.func @transform_14(%arg0: i32, %arg1: i32) -> (i32, i32, i32) {
    %c0_i32 = arith.constant 0 : i32
    %c0_i32_0 = arith.constant 0 : i32
    %c0_i32_1 = arith.constant 0 : i32
    return %arg1, %c0_i32, %c0_i32_0 : i32, i32, i32
  }
  func.func @transform_15(%arg0: i32, %arg1: i32) -> (i32, i32, i32) {
    %c0_i32 = arith.constant 0 : i32
    %c0_i32_0 = arith.constant 0 : i32
    %c0_i32_1 = arith.constant 0 : i32
    return %arg1, %c0_i32, %c0_i32_0 : i32, i32, i32
  }
  func.func @transform_16(%arg0: i32, %arg1: i32) -> (i32, i32, i32) {
    %c0_i32 = arith.constant 0 : i32
    %c0_i32_0 = arith.constant 0 : i32
    %c0_i32_1 = arith.constant 0 : i32
    return %arg1, %c0_i32, %c0_i32_0 : i32, i32, i32
  }
  func.func @transform_17(%arg0: i32, %arg1: i32) -> (i32, i32, i32) {
    %c0_i32 = arith.constant 0 : i32
    %c0_i32_0 = arith.constant 0 : i32
    %c0_i32_1 = arith.constant 0 : i32
    return %arg1, %c0_i32, %c0_i32_0 : i32, i32, i32
  }
  func.func @transform_18(%arg0: i32, %arg1: i32) -> (i32, i32) {
    %c0_i32 = arith.constant 0 : i32
    %c0_i32_0 = arith.constant 0 : i32
    %c0_i32_1 = arith.constant 0 : i32
    return %c0_i32, %c0_i32_0 : i32, i32
  }
  func.func @transform_19(%arg0: i32, %arg1: i32) -> (i32, i32) {
    %c0_i32 = arith.constant 0 : i32
    %c0_i32_0 = arith.constant 0 : i32
    %c0_i32_1 = arith.constant 0 : i32
    return %c0_i32, %c0_i32_0 : i32, i32
  }
  func.func @transform_20(%arg0: i32, %arg1: i32) -> (i32, i32, i32) {
    %c0_i32 = arith.constant 0 : i32
    %c0_i32_0 = arith.constant 0 : i32
    %c0_i32_1 = arith.constant 0 : i32
    return %arg0, %c0_i32, %c0_i32_0 : i32, i32, i32
  }
  func.func @transform_21(%arg0: i32, %arg1: i32) -> (i32, i32, i32, i32) {
    %c0_i32 = arith.constant 0 : i32
    %c0_i32_0 = arith.constant 0 : i32
    %c0_i32_1 = arith.constant 0 : i32
    return %arg1, %arg0, %c0_i32, %c0_i32_0 : i32, i32, i32, i32
  }
}

</mosaic_0001>

<bundles_post_ra>
// kernel: tpu_custom_call.1
= control target key start
LH: loop header
LB: loop body
LE: loop exit
PB: predicated region body
PF: predicated region fallthrough
CT: control target
= control target key end

     0   :  { %s4037_s0 = inlined_call_operand.vmem [shape: f32[2,8,32], index: 0, kind: input, shape index: {}]   ;;  %s4038_s1 = inlined_call_operand.vmem [shape: f32[2,8,1], index: 1, kind: input, shape index: {}]   ;;  %s4039_s2 = inlined_call_operand.vmem [shape: f32[3,1,32], index: 2, kind: input, shape index: {}]   ;;  %s4040_s3 = inlined_call_operand.vmem [shape: f32[3,1,32], index: 3, kind: input, shape index: {}]   ;;  %s4041_s4 = inlined_call_operand.vmem [shape: f32[3,1,32], index: 4, kind: input, shape index: {}]   ;;  %s4042_s5 = inlined_call_operand.hbm [shape: f32[3,1,32], index: 5, kind: input, shape index: {}]   ;;  %s4043_s6 = inlined_call_operand.hbm [shape: bf16[3,32,32], index: 6, kind: input, shape index: {}]   ;;  %s4044_s7 = inlined_call_operand.vmem [shape: f32[3,1,32], index: 7, kind: input, shape index: {}]   ;;  %s4045_s8 = inlined_call_operand.hbm [shape: bf16[3,32,32], index: 8, kind: input, shape index: {}]   ;;  %s4046_s9 = inlined_call_operand.vmem [shape: f32[3,1,32], index: 9, kind: input, shape index: {}]   ;;  %s4047_s10 = inlined_call_operand.hbm [shape: bf16[3,32,32], index: 10, kind: input, shape index: {}]   ;;  %s4048_s11 = inlined_call_operand.vmem [shape: f32[3,1,32], index: 11, kind: input, shape index: {}]   ;;  %s4049_s12 = inlined_call_operand.hbm [shape: bf16[3,32,32], index: 12, kind: input, shape index: {}]   ;;  %s4050_s13 = inlined_call_operand.vmem [shape: f32[3,1,32], index: 13, kind: input, shape index: {}]   ;;  %s4051_s14 = inlined_call_operand.hbm [shape: bf16[3,32,32], index: 14, kind: input, shape index: {}]   ;;  %s4052_s15 = inlined_call_operand.vmem [shape: f32[3,1,32], index: 15, kind: input, shape index: {}]   ;;  %s4053_s16 = inlined_call_operand.hbm [shape: bf16[3,32,32], index: 16, kind: input, shape index: {}]   ;;  %s4054_s17 = inlined_call_operand.vmem [shape: f32[3,1,32], index: 17, kind: input, shape index: {}]   ;;  %s4055_s18 = inlined_call_operand.vmem [shape: f32[1,32], index: 18, kind: input, shape index: {}]   ;;  %s4056_s19 = inlined_call_operand.vmem [shape: f32[1,32], index: 19, kind: input, shape index: {}]   ;;  %s4057_s20 = inlined_call_operand.hbm [shape: f32[2,8,32], index: 20, kind: output, shape index: {0}]   ;;  %s4058_s21 = inlined_call_operand.hbm [shape: f32[3,2,8,8], index: 21, kind: output, shape index: {1}]  }
   0x1   :  { %4089 = sst [smem:[#allocation46_spill]] %s4037_s0 }
   0x2   :  { %4090 = sst [smem:[#allocation47_spill]] %s4038_s1 }
   0x3   :  { %4091 = sst [smem:[#allocation48_spill]] %s4039_s2 }
   0x4   :  { %4092 = sst [smem:[#allocation49_spill]] %s4040_s3 }
   0x5   :  { %4093 = sst [smem:[#allocation50_spill]] %s4041_s4 }
   0x6   :  { %4094 = sst [smem:[#allocation51_spill]] %s4042_s5 }
   0x7   :  { %4095 = sst [smem:[#allocation52_spill]] %s4043_s6 }
   0x8   :  { %4096 = sst [smem:[#allocation53_spill]] %s4044_s7 }
   0x9   :  { %4097 = sst [smem:[#allocation54_spill]] %s4045_s8 }
   0xa   :  { %4098 = sst [smem:[#allocation55_spill]] %s4046_s9 }
   0xb   :  { %4099 = sst [smem:[#allocation56_spill]] %s4047_s10 }
   0xc   :  { %4100 = sst [smem:[#allocation57_spill]] %s4048_s11 }
   0xd   :  { %4101 = sst [smem:[#allocation58_spill]] %s4049_s12 }
   0xe   :  { %4102 = sst [smem:[#allocation59_spill]] %s4050_s13 }
   0xf   :  { %4103 = sst [smem:[#allocation60_spill]] %s4051_s14 }
  0x10   :  { %4104 = sst [smem:[#allocation61_spill]] %s4052_s15 }
  0x11   :  { %4105 = sst [smem:[#allocation62_spill]] %s4053_s16 }
  0x12   :  { %4106 = sst [smem:[#allocation63_spill]] %s4054_s17 }
  0x13   :  { %4107 = sst [smem:[#allocation64_spill]] %s4055_s18 }
  0x14   :  { %4108 = sst [smem:[#allocation65_spill]] %s4056_s19 }
  0x15   :  { %4109 = sst [smem:[#allocation66_spill]] %s4057_s20 }
  0x16   :  { %4110 = sst [smem:[#allocation67_spill]] %s4058_s21 }
  0x17   :  { %27 = vsyncpa [#allocation5], 0 }
  0x18   :  { %29 = vsyncpa [#allocation5 + $0x1], 0 }
  0x19   :  { %30 = vsyncpa [#allocation8], 0 }
  0x1a   :  { %32 = vsyncpa [#allocation8 + $0x1], 0 }
  0x1b   :  { %33 = vsyncpa [#allocation11], 0 }
  0x1c   :  { %35 = vsyncpa [#allocation11 + $0x1], 0 }
  0x1d   :  { %36 = vsyncpa [#allocation14], 0 }
  0x1e   :  { %38 = vsyncpa [#allocation14 + $0x1], 0 }
  0x1f   :  { %39 = vsyncpa [#allocation6], 0 }
  0x20   :  { %41 = vsyncpa [#allocation6 + $0x1], 0 }
  0x21   :  { %42 = vsyncpa [#allocation18], 0 }
  0x22   :  { %44 = vsyncpa [#allocation18 + $0x1], 0  ;;  %s3389_s2 = smov 0   ;;  %s3391_s25 = smov 0  }
  0x23   :  { %s3393_s26 = smov 0   ;;  %s3395_s27 = smov 0  }
  0x24   :  { %s3397_s3 = smov 0   ;;  %s3399_s28 = smov 0  }
  0x25   :  { %s3401_s29 = smov 0   ;;  %s3403_s0 = smov 0  }
  0x26   :  { %s3405_s4 = smov 0   ;;  %s3407_s30 = smov 0  }
  0x27   :  { %s3409_s5 = smov 0   ;;  %s3411_s22 = smov 0  }
  0x28   :  { %s3413_s23 = smov 0   ;;  %s3415_s1 = smov 0  }
  0x29 LB: > { %4111 = sst [smem:[#allocation25_spill]] %s3205_s2  ;;  %s3458_s24 = sadd.s32 4294967295, %s3257_s1   ;;  %s3257_s1 = sphi %s3415_s1, %s50_s1   ;;  %s3253_s23 = sphi %s3413_s23, %s4221_s23   ;;  %s3249_s22 = sphi %s3411_s22, %s4220_s22   ;;  %s3245_s5 = sphi %s3409_s5, %s4219_s5   ;;  %s3241_s30 = sphi %s3407_s30, %s4218_s30   ;;  %s3237_s4 = sphi %s3405_s4, %s4217_s4   ;;  %s3233_s0 = sphi %s3403_s0, %s4223_s0   ;;  %s3229_s29 = sphi %s3401_s29, %s4222_s29   ;;  %s3225_s28 = sphi %s3399_s28, %s4215_s28   ;;  %s3221_s3 = sphi %s3397_s3, %s4214_s3   ;;  %s3217_s27 = sphi %s3395_s27, %s4213_s27   ;;  %s3213_s26 = sphi %s3393_s26, %s4212_s26   ;;  %s3209_s25 = sphi %s3391_s25, %s4211_s25   ;;  %s3205_s2 = sphi %s3389_s2, %s4210_s2  }
  0x2a   : > { %4112 = sst [smem:[#allocation26_spill]] %s3209_s25  ;;  %s2452_s21 = sadd.s32 4294967294, %s3257_s1  }
  0x2b   : > { %4113 = sst [smem:[#allocation27_spill]] %s3213_s26  ;;  %s59_s20 = sadd.s32 1, %s3249_s22 }
  0x2c   : > { %4114 = sst [smem:[#allocation28_spill]] %s3217_s27  ;;  %s62_s19 = sadd.s32 1, %s3253_s23 }
  0x2d   : > { %4115 = sst [smem:[#allocation29_spill]] %s3221_s3  ;;  %p60_p0 = scmp.ge.s32.totalorder %s59_s20, 3 }
  0x2e   : > { %4116 = sst [smem:[#allocation30_spill]] %s3225_s28  ;;  %s199_s18 = sadd.s32 1, %s3237_s4 }
  0x2f   : > { %4117 = sst [smem:[#allocation31_spill]] %s3237_s4  ;;  %p206_p1 = scmp.ne.s32.totalorder %s3237_s4, %s3233_s0 }
  0x30   : > { %4118 = sst [smem:[#allocation32_spill]] %s3241_s30  ;;  %p207_p2 = scmp.eq.s32.totalorder %s3257_s1, 0 }
  0x31   : > { %4119 = sst [smem:[#allocation33_spill]] %s3245_s5  ;;  %s4225_s20 = smov (%p60_p0, %s59_s20), 0 }
  0x32   : > { %4120 = sst [smem:[#allocation34_spill]] %s3249_s22  ;;  %s4227_s19 = smov (!%p60_p0, %s62_s19), %s3253_s23 }
  0x33   : > { %4121 = sst [smem:[#allocation35_spill]] %s3253_s23  ;;  %s196_s17 = ssub.s32 %s3249_s22, %s4225_s20 }
  0x34   : > { %4122 = sst [smem:[#allocation36_spill]] %s3257_s1  ;;  %p3472_p3 = por %p207_p2, %p206_p1 }
  0x35   : > { %4123 = sst [smem:[#allocation37_spill]] %s4225_s20  ;;  %p64_p4 = scmp.ge.s32.totalorder %s4227_s19, 2 }
  0x36   : > { %p197_p5 = scmp.eq.s32.totalorder %s196_s17, 0  ;;  %p212_p6 = scmp.ne.s32.totalorder %s3233_s0, %s3229_s29 }
  0x37   : > { %p213_p7 = scmp.eq.s32.totalorder %s3458_s24, 0  ;;  %s4229_s19 = smov (%p64_p4, %s4227_s19), 0 }
  0x38   : > { %4125 = sst [smem:[#allocation38_spill]] %s4229_s19  ;;  %s576_s11 = ssub.s32 %s3253_s23, %s4229_s19 }
  0x39   : > { %s3481_s13 = scalar_select %p197_p5, %s3237_s4, %s199_s18  }
  0x3a   : > { %p3483_p8 = por %p213_p7, %p212_p6  ;;  %p577_p9 = scmp.eq.s32.totalorder %s576_s11, 0 }
  0x3b   : > { %4126 = sst [smem:[#allocation39_spill]] %s3481_s13  ;;  %s579_s29 = sadd.s32 1, %s3225_s28 }
  0x3c   : > { %p589_p10 = scmp.ne.s32.totalorder %s3225_s28, %s3221_s3  ;;  %p590_p11 = scmp.eq.s32.totalorder %s3458_s24, 5 }
  0x3d   : > { %s3494_s9 = scalar_select %p577_p9, %s3225_s28, %s579_s29  }
  0x3e   : > { %p3496_p12 = por %p590_p11, %p589_p10  ;;  %p595_p13 = scmp.ne.s32.totalorder %s3221_s3, %s3217_s27 }
  0x3f   : > { %4128 = sst [smem:[#allocation40_spill]] %s3494_s9  ;;  %p596_p0 = scmp.eq.s32.totalorder %s2452_s21, 5 }
  0x40   : > { %s4129_s18 = scalar_select %p3496_p12, 1, 0 }
  0x41   : > { %s604_s19 = sor.u32 %s576_s11, %s196_s17  ;;  %s607_s23 = sadd.s32 1, %s3213_s26 }
  0x42   : > { %4130 = sst [smem:[#allocation41_spill]] %s4129_s18  ;;  %p605_p1 = scmp.eq.s32.totalorder %s604_s19, 0 }
  0x43   : > { %p3503_p2 = por %p596_p0, %p595_p13  ;;  %p617_p4 = scmp.ne.s32.totalorder %s3213_s26, %s3209_s25 }
  0x44   : > { %s3510_s7 = scalar_select %p605_p1, %s3213_s26, %s607_s23  }
  0x45   : > { %s4131_s13 = scalar_select %p3503_p2, 1, 0 }
  0x46   : > { %4133 = sst [smem:[#allocation43_spill]] %s3510_s7  ;;  %p3512_p5 = por %p617_p4, %p590_p11 }
  0x47   : > { %4132 = sst [smem:[#allocation42_spill]] %s4131_s13  ;;  %p623_p6 = scmp.ne.s32.totalorder %s3209_s25, %s3205_s2 }
  0x48   : > { %s4134_s29 = scalar_select %p3512_p5, 1, 0 }
  0x49   : > { %p2715_p7 = scmp.lt.s32.totalorder %s3257_s1, 6  ;;  %p3519_p9 = por %p623_p6, %p596_p0 }
  0x4a   : > { %4135 = sst [smem:[#allocation44_spill]] %s4134_s29  ;;  %s3524_s11 = sand.u32 1, %s3237_s4  }
  0x4b   : > { %s4136_s9 = scalar_select %p3519_p9, 1, 0 }
  0x4c   : > { %p3528_p10 = pnand %p2715_p7, %p3472_p3  ;;  %s3533_s19 = sand.u32 1, %s3257_s1  }
  0x4d   : > { %4137 = sst [smem:[#allocation45_spill]] %s4136_s9  ;;  %s3536_s21 = sshll.u32 %s3524_s11, 4 }
  0x4e   : > { %s3539_s23 = sshll.u32 %s3249_s22, 8  ;;  %s703_s28 = scalar_lea.vmem [#allocation7], %s3536_s21 }
  0x4f   : > { %s710_s7 = sshll.u32 %s703_s28, 4  ;;  %s4139_s6 = sld [smem:[#allocation52_spill]]  ;;  %s711_s7 = int_to_ptr.vmem [resolvable:$true] %s710_s7 }
  0x50   : > { %s4078_s9 = scalar_lea.sflag [#allocation8], %s3533_s19  ;;  %p3549_p3 = pneg %p3528_p10 }
  0x51   : > { %s2888_s13 = scalar_lea.vmem %s711_s7, 256  ;;  %s3259_s27 = smov [#allocation7]  }
  0x52   : > { %p2889_p11 = scmp.ne.s32.totalorder %s711_s7, %s2888_s13  ;;  %s2893_s29 = sshll.u32 %s3259_s27, 4  ;;  %s2894_s29 = int_to_ptr.vmem [resolvable:$false] %s2893_s29 }
  0x53   : > { %s2895_s28 = scalar_lea.vmem %s2894_s29, 512  ;;  %p2896_p1 = scmp.lt.s32.totalorder %s711_s7, %s2894_s29 }
  0x54   : > { %p2891_p13 = pnand %p2889_p11, %p3549_p3  ;;  %p2897_p4 = scmp.lt.s32.totalorder %s2895_s28, %s2888_s13 }
  0x55   : > { %s709_s15 = scalar_lea.hbm %s4139_s6, %s3539_s23 }
  0x56   : > { %p2892_p0 = pneg %p2891_p13  ;;  %p2898_p6 = por %p2897_p4, %p2896_p1 }
  0x58   : > { %p2899_p7 = pnand %p2898_p6, %p2892_p0 }
  0x5a   : > { %2902 = shalt.err (!%p2899_p7)
}
  0x5b   : > { %s3260_s26 = smov 64   ;;  %s3261_s4 = smov 4  }
  0x5c   : > { %2692 = dma.hbm_to_vmem [thread:$0]  (!%p3528_p10), %s709_s15, 256, %s711_s7, %s4078_s9, %s3260_s26, %s3260_s26, %s3261_s4  }
  0x5d   : > { %p2474_p11 = scmp.ge.s32.totalorder %s3257_s1, 1  ;;  %p859_p13 = scmp.lt.s32.totalorder %s3257_s1, 7 }
  0x5e   : > { %s4142_s10 = sld [smem:[#allocation56_spill]]  ;;  %s757_s6 = scalar_lea.vmem [#allocation10], %s3536_s21 }
  0x5f   : > { %p3564_p0 = pnand %p2474_p11, %p859_p13  ;;  %s764_s18 = sshll.u32 %s757_s6, 4  ;;  %s765_s18 = int_to_ptr.vmem [resolvable:$true] %s764_s18 }
  0x60   : > { %s4083_s30 = scalar_lea.sflag [#allocation11], %s3533_s19  ;;  %s2916_s5 = scalar_lea.vmem %s765_s18, 256 }
  0x61   : > { %p2917_p1 = scmp.ne.s32.totalorder %s765_s18, %s2916_s5  ;;  %s3262_s7 = smov [#allocation10]  }
  0x62   : > { %s2921_s15 = sshll.u32 %s3262_s7, 4  ;;  %s2922_s15 = int_to_ptr.vmem [resolvable:$false] %s2921_s15 }
  0x63   : > { %p2919_p4 = pnand %p2917_p1, %p3549_p3  ;;  %s2923_s9 = scalar_lea.vmem %s2922_s15, 512 }
  0x64   : > { %s763_s28 = scalar_lea.hbm %s4142_s10, %s3539_s23  ;;  %p2924_p7 = scmp.lt.s32.totalorder %s765_s18, %s2922_s15 }
  0x65   : > { %p2920_p6 = pneg %p2919_p4  ;;  %p2925_p11 = scmp.lt.s32.totalorder %s2923_s9, %s2916_s5 }
  0x67   : > { %p2926_p13 = por %p2925_p11, %p2924_p7 }
  0x69   : > { %p2927_p9 = pnand %p2926_p13, %p2920_p6 }
  0x6b   : > { %2930 = shalt.err (!%p2927_p9)
}
  0x6c   : > { %2698 = dma.hbm_to_vmem [thread:$0]  (!%p3528_p10), %s763_s28, 256, %s765_s18, %s4083_s30, %s3260_s26, %s3260_s26, %s3261_s4  }
  0x6d   : > { %s4143_s14 = sld [smem:[#allocation60_spill]]  ;;  %s811_s9 = scalar_lea.vmem [#allocation13], %s3536_s21 }
  0x6e   : > { %s818_s5 = sshll.u32 %s811_s9, 4  ;;  %s808_s7 = scalar_lea.sflag [#allocation14], %s3533_s19  ;;  %s819_s5 = int_to_ptr.vmem [resolvable:$true] %s818_s5 }
  0x6f   : > { %s2944_s15 = scalar_lea.vmem %s819_s5, 256  ;;  %s3263_s10 = smov [#allocation13]  }
  0x70   : > { %p2945_p9 = scmp.ne.s32.totalorder %s819_s5, %s2944_s15  ;;  %s2949_s1 = sshll.u32 %s3263_s10, 4  ;;  %s2950_s1 = int_to_ptr.vmem [resolvable:$false] %s2949_s1 }
  0x71   : > { %s2951_s25 = scalar_lea.vmem %s2950_s1, 512  ;;  %p2952_p6 = scmp.lt.s32.totalorder %s819_s5, %s2950_s1 }
  0x72   : > { %p2947_p1 = pnand %p2945_p9, %p3549_p3  ;;  %p2953_p7 = scmp.lt.s32.totalorder %s2951_s25, %s2944_s15 }
  0x73   : > { %s817_s29 = scalar_lea.hbm %s4143_s14, %s3539_s23 }
  0x74   : > { %p2948_p4 = pneg %p2947_p1  ;;  %p2954_p11 = por %p2953_p7, %p2952_p6 }
  0x76   : > { %p2955_p13 = pnand %p2954_p11, %p2948_p4 }
  0x78   : > { %2958 = shalt.err (!%p2955_p13)
}
  0x79   : > { %2704 = dma.hbm_to_vmem [thread:$0]  (!%p3528_p10), %s817_s29, 256, %s819_s5, %s808_s7, %s3260_s26, %s3260_s26, %s3261_s4  }
  0x7a   : > { %s2455_s10 = sshll.u32 %s3249_s22, 4  ;;  %s4144_s1 = sld [smem:[#allocation51_spill]] }
  0x7b   : > { %s685_s6 = scalar_lea.vmem [#allocation4], %s3524_s11  ;;  %s683_s9 = scalar_lea.sflag [#allocation5], %s3524_s11 }
  0x7c   : > { %s692_s27 = sshll.u32 %s685_s6, 4  ;;  %s3264_s30 = smov [#allocation4]   ;;  %s693_s27 = int_to_ptr.vmem [resolvable:$true] %s692_s27 }
  0x7d   : > { %s2972_s15 = scalar_lea.vmem %s693_s27, 16  ;;  %s2977_s14 = sshll.u32 %s3264_s30, 4  ;;  %s2978_s14 = int_to_ptr.vmem [resolvable:$false] %s2977_s14 }
  0x7e   : > { %p2973_p9 = scmp.ne.s32.totalorder %s693_s27, %s2972_s15  ;;  %s2979_s3 = scalar_lea.vmem %s2978_s14, 32 }
  0x7f   : > { %p2980_p6 = scmp.lt.s32.totalorder %s693_s27, %s2978_s14  ;;  %p2981_p7 = scmp.lt.s32.totalorder %s2979_s3, %s2972_s15 }
  0x80   : > { %s690_s25 = scalar_lea.hbm %s4144_s1, %s2455_s10  ;;  %p2975_p1 = pnand %p2973_p9, %p3549_p3 }
  0x81   : > { %p2982_p11 = por %p2981_p7, %p2980_p6 }
  0x82   : > { %p2976_p4 = pneg %p2975_p1 }
  0x84   : > { %p2983_p13 = pnand %p2982_p11, %p2976_p4 }
  0x86   : > { %2986 = shalt.err (!%p2983_p13)
}
  0x87   : > { %2689 = dma.hbm_to_vmem [thread:$0]  (!%p3528_p10), %s690_s25, 16, %s693_s27, %s683_s9  }
  0x88   : > { %s4145_s8 = sld [smem:[#allocation54_spill]]  ;;  %s730_s10 = scalar_lea.vmem [#allocation9], %s3536_s21 }
  0x89   : > { %s737_s18 = sshll.u32 %s730_s10, 4  ;;  %s3265_s14 = smov [#allocation9]   ;;  %s738_s18 = int_to_ptr.vmem [resolvable:$true] %s737_s18 }
  0x8a   : > { %s3000_s30 = scalar_lea.vmem %s738_s18, 256  ;;  %s3005_s3 = sshll.u32 %s3265_s14, 4  ;;  %s3006_s3 = int_to_ptr.vmem [resolvable:$false] %s3005_s3 }
  0x8b   : > { %p3001_p9 = scmp.ne.s32.totalorder %s738_s18, %s3000_s30  ;;  %s3007_s28 = scalar_lea.vmem %s3006_s3, 512 }
  0x8c   : > { %p3008_p4 = scmp.lt.s32.totalorder %s738_s18, %s3006_s3  ;;  %p3009_p7 = scmp.lt.s32.totalorder %s3007_s28, %s3000_s30 }
  0x8d   : > { %p3003_p1 = pnand %p3001_p9, %p3549_p3 }
  0x8e   : > { %s736_s5 = scalar_lea.hbm %s4145_s8, %s3539_s23  ;;  %p3010_p11 = por %p3009_p7, %p3008_p4 }
  0x8f   : > { %p3004_p6 = pneg %p3003_p1 }
  0x91   : > { %p3011_p13 = pnand %p3010_p11, %p3004_p6 }
  0x93   : > { %3014 = shalt.err (!%p3011_p13)
}
  0x94   : > { %s4146_s1 = scalar_lea.sflag [#allocation8], %s3533_s19  ;;  %s4147_s12 = sld [smem:[#allocation58_spill]] }
  0x95   : > { %2695 = dma.hbm_to_vmem [thread:$0]  (!%p3528_p10), %s736_s5, 256, %s738_s18, %s4146_s1, %s3260_s26, %s3260_s26, %s3261_s4  }
  0x96   : > { %s784_s9 = scalar_lea.vmem [#allocation12], %s3536_s21  ;;  %s3266_s29 = smov [#allocation12]  }
  0x97   : > { %s791_s15 = sshll.u32 %s784_s9, 4  ;;  %s3033_s10 = sshll.u32 %s3266_s29, 4  ;;  %s792_s15 = int_to_ptr.vmem [resolvable:$true] %s791_s15  ;;  %s3034_s10 = int_to_ptr.vmem [resolvable:$false] %s3033_s10 }
  0x98   : > { %s3028_s11 = scalar_lea.vmem %s792_s15, 256  ;;  %s3035_s30 = scalar_lea.vmem %s3034_s10, 512 }
  0x99   : > { %p3029_p9 = scmp.ne.s32.totalorder %s792_s15, %s3028_s11  ;;  %p3036_p4 = scmp.lt.s32.totalorder %s792_s15, %s3034_s10 }
  0x9a   : > { %s790_s27 = scalar_lea.hbm %s4147_s12, %s3539_s23  ;;  %p3037_p7 = scmp.lt.s32.totalorder %s3035_s30, %s3028_s11 }
  0x9b   : > { %p3031_p1 = pnand %p3029_p9, %p3549_p3 }
  0x9c   : > { %p3038_p11 = por %p3037_p7, %p3036_p4 }
  0x9d   : > { %p3032_p6 = pneg %p3031_p1 }
  0x9f   : > { %p3039_p13 = pnand %p3038_p11, %p3032_p6 }
  0xa1   : > { %3042 = shalt.err (!%p3039_p13)
}
  0xa2   : > { %s4148_s5 = scalar_lea.sflag [#allocation11], %s3533_s19  ;;  %s4149_s16 = sld [smem:[#allocation62_spill]] }
  0xa3   : > { %2701 = dma.hbm_to_vmem [thread:$0]  (!%p3528_p10), %s790_s27, 256, %s792_s15, %s4148_s5, %s3260_s26, %s3260_s26, %s3261_s4  }
  0xa4   : > { %s838_s28 = scalar_lea.vmem [#allocation15], %s3536_s21  ;;  %s3267_s6 = smov [#allocation15]  }
  0xa5   : > { %s845_s1 = sshll.u32 %s838_s28, 4  ;;  %s3061_s9 = sshll.u32 %s3267_s6, 4  ;;  %s846_s1 = int_to_ptr.vmem [resolvable:$true] %s845_s1  ;;  %s3062_s9 = int_to_ptr.vmem [resolvable:$false] %s3061_s9 }
  0xa6   : > { %s3056_s25 = scalar_lea.vmem %s846_s1, 256  ;;  %s3063_s11 = scalar_lea.vmem %s3062_s9, 512 }
  0xa7   : > { %p3057_p9 = scmp.ne.s32.totalorder %s846_s1, %s3056_s25  ;;  %p3064_p4 = scmp.lt.s32.totalorder %s846_s1, %s3062_s9 }
  0xa8   : > { %s844_s3 = scalar_lea.hbm %s4149_s16, %s3539_s23  ;;  %p3065_p7 = scmp.lt.s32.totalorder %s3063_s11, %s3056_s25 }
  0xa9   : > { %p3059_p1 = pnand %p3057_p9, %p3549_p3 }
  0xaa   : > { %p3066_p11 = por %p3065_p7, %p3064_p4 }
  0xab   : > { %p3060_p6 = pneg %p3059_p1 }
  0xad   : > { %p3067_p13 = pnand %p3066_p11, %p3060_p6 }
  0xaf   : > { %3070 = shalt.err (!%p3067_p13)
}
  0xb0   : > { %2707 = dma.hbm_to_vmem [thread:$0]  (!%p3528_p10), %s844_s3, 256, %s846_s1, %s808_s7, %s3260_s26, %s3260_s26, %s3261_s4  }
  0xb1   : > { %863 = sbr.rel (%p3564_p0) target bundleno = 2999 (0xbb7), region = 100  ;;  %s3653_s2 = sand.u32 (!%p3564_p0), 1, %s3233_s0  }
  0xb2   : > { %s866_s21 = scalar_lea.sflag (!%p3564_p0), [#allocation5], %s3653_s2 }
  0xb6   : > { %3180 = dma.done.wait (%p3483_p8), %s866_s21, 16  }
  0xb7   : > { %3182 = vsyncadd (%p3483_p8), %s866_s21, 4294967280  ;;  %s873_s17 = sand.u32 1, %s3458_s24   ;;  %s3663_s19 = sshll.u32 %s3653_s2, 4 }
  0xb8   : > { %s874_s26 = scalar_lea.sflag [#allocation8], %s873_s17 }
  0xb9   : > { %3184 = dma.done.wait (%p3483_p8), %s874_s26, 512  }
  0xba   : > { %3186 = vsyncadd (%p3483_p8), %s874_s26, 4294966784  ;;  %s892_s7 = scalar_lea.sflag [#allocation11], %s873_s17 }
  0xbb   : > { %3188 = dma.done.wait (%p3483_p8), %s892_s7, 512  }
  0xbc   : > { %3190 = vsyncadd (%p3483_p8), %s892_s7, 4294966784  ;;  %s910_s15 = scalar_lea.sflag [#allocation14], %s873_s17 }
  0xbd   : > { %3192 = dma.done.wait (%p3483_p8), %s910_s15, 512  }
  0xbe   : > { %3194 = vsyncadd (%p3483_p8), %s910_s15, 4294966784  ;;  %s4150_s10 = sld [smem:[#allocation29_spill]]  ;;  %s922_s9 = scalar_lea.vmem [#allocation15], %s3663_s19 }
  0xbf   : > { %s4151_s30 = sld [smem:[#allocation26_spill]] }
  0xc0   : > { %s4152_s5 = sld [smem:[#allocation33_spill]] }
  0xc1   : > { %s4153_s18 = sld [smem:[#allocation32_spill]] }
  0xc2   : > { %s4154_s11 = sld [smem:[#allocation46_spill]] }
  0xc3   : > { %s4155_s7 = sld [smem:[#allocation47_spill]] }
  0xc4   : > { %s4087_s14 = sand.u32 1, %s4150_s10   ;;  %s4161_s10 = sld [smem:[#allocation57_spill]] }
  0xc5   : > { %s3685_s3 = sshll.u32 %s4087_s14, 3  ;;  %s4086_s28 = sand.u32 1, %s4151_s30  }
  0xc6   : > { %s3690_s1 = sshll.u32 %s4086_s28, 3  ;;  %p1050_p10 = scmp.lt.s32.totalorder %s4152_s5, 1 }
  0xc7   : > { %p1058_p3 = scmp.lt.s32.totalorder %s4153_s18, 2  ;;  %s4162_s23 = sld [smem:[#allocation59_spill]] }
  0xc8   : > { %s4231_s5 = smov (!%p1050_p10, %s4152_s5), 1  ;;  %s4163_s4 = sld [smem:[#allocation61_spill]] }
  0xc9   : > { %s3696_s20 = scalar_select %p1058_p3, %s4153_s18, 2 }
  0xca   : > { %s2483_s25 = sshll.u32 %s4231_s5, 3  ;;  %s4164_s12 = sld [smem:[#allocation63_spill]] }
  0xcb   : > { %s1053_s21 = scalar_lea.vmem %s4154_s11, %s2483_s25  ;;  %s3704_s15 = scalar_lea.vmem %s4155_s7, %s2483_s25 }
  0xcc   : > { %s4160_s25 = sld [smem:[#allocation55_spill]]  ;;  %s1075_s28 = scalar_lea.vmem %s4161_s10, %s3696_s20 }
  0xcd   : > { %s1078_s24 = scalar_lea.vmem %s4162_s23, %s3696_s20  ;;  %s1042_s11 = scalar_lea.vmem [#allocation16], %s3685_s3 }
  0xce   : > { %s1081_s13 = scalar_lea.vmem %s4163_s4, %s3696_s20  ;;  %s1049_s16 = scalar_lea.vmem [#allocation17], %s3690_s1 }
  0xcf   : > { %p2485_p8 = scmp.ne.s32.totalorder %s4153_s18, 0 }
  0xd0   : > { %s1084_s6 = scalar_lea.vmem %s4164_s12, %s3696_s20 }
  0xd1   : > { %1089 = sbr.rel (%p2485_p8) target bundleno = 216 (0xd8), region = 132 }
  0xd2   : > { %s1072_s26 = scalar_lea.vmem %s4160_s25, %s3696_s20 }
  0xd6   : > { %v1090_v0 = vld [vmem:[%s1053_s21] sm:$0xff]  ;;  %vm1091_vm0 = vcmask 261120  }
  0xd7   : > { %1092 = vst.msk [vmem:[#allocation2] sm:$0xff] %vm1091_vm0, %v1090_v0 }
  0xd8 PF: > { %vm1097_vm1 = vcmask 261120   ;;  %s4165_s8 = scalar_lea.vmem [#allocation7], %s3663_s19  ;;  %s4166_s22 = scalar_lea.vmem [#allocation9], %s3663_s19  ;;  %v3268_v10 = vmov 0.0   ;;  %vm3269_vm2 = vmmov 0   ;;  %vm1328_vm3 = vcmask 64512  }
  0xd9   : > { %v2841_v8 = vld [vmem:[%s4165_s8 + $0x8] sm:$0xff]   ;;  %2572 = vmatprep.subr.bf16.mxu0 %v3268_v10  ;;  %2580 = vmatprep.subr.bf16.mxu1 %v3268_v10  ;;  %s4167_s27 = smov %s4165_s8  ;;  %s4168_s18 = smov %s4166_s22  ;;  %vm1392_vm4 = vcmask 1043456   ;;  %v1320_v58 = vlaneseq  ;;  %vm1556_vm6 = vcmask 130112   ;;  %vm1674_vm7 = vcmask 195712  }
  0xda   : > { %v2842_v9 = vld [vmem:[%s4166_s22 + $0x8] sm:$0xff]   ;;  %2573 = vmatpush3.bf16.msra.mxu0 %v2841_v8  ;;  %2576 = vmatprep.mubr.msk.bf16.mxu0 %vm3269_vm2, %v3268_v10  ;;  %s4169_s17 = sld [smem:[#allocation48_spill]]  ;;  %s4173_s29 = scalar_lea.vmem [#allocation10], %s3663_s19  ;;  %vm1792_vm8 = vcmask 261312  }
  0xdb   : > { %2581 = vmatpush3.bf16.msra.mxu1 %v2842_v9  ;;  %v2843_v11 = vld [vmem:[%s4167_s27] sm:$0xff]   ;;  %2574 = vmatprep.subr.bf16.mxu0 %v3268_v10  ;;  %s4171_s30 = sld [smem:[#allocation49_spill]]  ;;  %s4174_s4 = smov %s4173_s29  ;;  %v1321_v59 = vshrl.u32 %v1320_v58, 7  ;;  %v1323_v60 = vand.u32 127, %v1320_v58 }
  0xdc   : > { %v2844_v12 = vld [vmem:[%s4168_s18] sm:$0xff]   ;;  %2582 = vmatprep.subr.bf16.mxu1 %v3268_v10  ;;  %2584 = vmatprep.mubr.msk.bf16.mxu1 %vm3269_vm2, %v3268_v10  ;;  %s4175_s8 = sld [smem:[#allocation53_spill]]  ;;  %s3270_s21 = smov 112  }
  0xdd   : > { %v2845_v22 = vld [vmem:[%s4173_s29 + $0x8] sm:$0xff]   ;;  %vm1324_vm5 = vcmp.le.s32.totalorder %v1323_v60, %v1321_v59  ;;  %s3273_s10 = smov 8   ;;  %s4184_s14 = sld [smem:[#allocation50_spill]] }
  0xde   : > { %v3746_v1 = vld [vmem:[#allocation2] sm:$0xff]  ;;  %2575 = vmatpush3.bf16.msra.mxu0 %v2843_v11 }
  0xdf   : > { %v1098_v2 = vsel %vm1097_vm1, %v3746_v1, 0.0  ;;  %2583 = vmatpush3.bf16.msra.mxu1 %v2844_v12  ;;  %2588 = vmatprep.subr.bf16.mxu0 %v3268_v10  ;;  %v2846_v24 = vld [vmem:[%s4174_s4] sm:$0xff]   ;;  %s3275_s4 = smov 24  }
  0xe0   : > { %1099 = vadd.xlane.f32.xlu0 %v1098_v2  ;;  %2596 = vmatprep.subr.bf16.mxu1 %v3268_v10  ;;  %s4170_s25 = scalar_lea.vmem %s4169_s17, %s3696_s20  ;;  %v2492_v26 = vld [vmem:[%s1072_s26] ss:$0 sm:$0xff]  ;;  %s3271_s17 = smov 120  }
  0xe1   : > { %v2486_v17 = vld [vmem:[%s4170_s25] ss:$0 sm:$0xff]  ;;  %s4172_s23 = scalar_lea.vmem %s4171_s30, %s3696_s20  ;;  %s3274_s30 = smov 16  }
  0xe2   : > { %v2487_v19 = vld [vmem:[%s4172_s23] ss:$0 sm:$0xff]  ;;  %s4176_s22 = scalar_lea.vmem %s4175_s8, %s3696_s20  ;;  %s4179_s23 = scalar_lea.vmem [#allocation12], %s3663_s19 }
  0xe3   : > { %v2488_v25 = vld [vmem:[%s4176_s22] ss:$0 sm:$0xff]  ;;  %s4180_s29 = smov %s4179_s23 }
  0xe4   : > { %v2496_v40 = vld [vmem:[%s1075_s28] ss:$0 sm:$0xff]  ;;  %s3272_s28 = smov 104  }
 0x169   : > { %v1100_v3 = vpop.xlane.xlu0 %1099 }
 0x16a   : > { %v1102_v4 = vmul.f32 0.03125, %v1100_v3 }
 0x16c   : > { %v1103_v5 = vsub.f32 %v3746_v1, %v1102_v4 }
 0x16e   : > { %v1104_v6 = vmul.f32 %v1103_v5, %v1103_v5 }
 0x170   : > { %v1105_v7 = vsel %vm1097_vm1, %v1104_v6, 0.0 }
 0x171   : > { %1106 = vadd.xlane.f32.xlu0 %v1105_v7 }
 0x1fa   : > { %v1107_v13 = vpop.xlane.xlu0 %1106 }
 0x1fb   : > { %v1108_v14 = vmul.f32 0.03125, %v1107_v13 }
 0x1fd   : > { %v1109_v15 = vadd.f32 1e-05, %v1108_v14 }
 0x1ff   : > { %2853 = vrsqrt.f32 %v1109_v15 }
 0x20c   : > { %v2854_v16 = vpop.eup %2853 }
 0x20d   : > { %v1111_v18 = vmul.f32 %v2854_v16, %v1103_v5 }
 0x20f   : > { %v1118_v20 = vmul.f32 %v2486_v17, %v1111_v18 }
 0x211   : > { %v1125_v21 = vadd.f32 %v2487_v19, %v1118_v20 }
 0x213   : > { %v1126_v23 = vpack.c.bf16 %v1125_v21, %v1125_v21 }
 0x215   : > { %2577 = vmatmul.mubr.msk.bf16.vlgmr.msra.gmra.mxu0 %vm1097_vm1, %v1126_v23  ;;  %2585 = vmatmul.mubr.msk.bf16.vlgmr.msra.gmra.mxu1 %vm1097_vm1, %v1126_v23 }
 0x216   : > { %2589 = vmatpush3.bf16.msra.mxu0 %v2845_v22  ;;  %2592 = vmatprep.mubr.msk.bf16.mxu0 %vm3269_vm2, %v3268_v10 }
 0x217   : > { %2590 = vmatprep.subr.bf16.mxu0 %v3268_v10  ;;  %2598 = vmatprep.mubr.msk.bf16.mxu1 %vm3269_vm2, %v3268_v10 }
 0x21a   : > { %2591 = vmatpush3.bf16.msra.mxu0 %v2846_v24 }
 0x21b   : > { %2602 = vmatprep.subr.bf16.mxu0 %v3268_v10 }
 0x21d   : > { %2593 = vmatmul.mubr.msk.bf16.vlgmr.msra.gmra.mxu0 %vm1097_vm1, %v1126_v23 }
 0x21e   : > { %2604 = vmatprep.mubr.msk.bf16.mxu0 %vm3269_vm2, %v3268_v10 }
 0x2d5   : > { %v1187_v27 = vpop.f32.mrf.mxu0  ;;  %v1251_v28 = vpop.f32.mrf.mxu1 }
 0x2d6   : > { %v1188_v29 = vadd.f32 %v2488_v25, %v1187_v27  ;;  %v1252_v30 = vadd.f32 %v2492_v26, %v1251_v28 }
 0x2d7   : > { %v2578_v31 = vpop.f32.mrf.mxu0  ;;  %v2586_v32 = vpop.f32.mrf.mxu1 }
 0x2d8   : > { %v1193_v33 = vmul.f32 0.35355338, %v1188_v29  ;;  %v1326_v34 = vpack.c.bf16 %v1252_v30, %v1252_v30 }
 0x2d9   : > { %v1190_v35 = vpop.f32.mrf.mxu0  ;;  %v1254_v36 = vpop.f32.mrf.mxu1 }
 0x2da   : > { %1560 = vrot.lane.b32.xlu0 %v1326_v34, %s3270_s21  ;;  %1441 = vrot.lane.b32.xlu1 %v1326_v34, %s3271_s17  ;;  %v1333_v37 = vsel %vm1328_vm3, %v1326_v34, 0  ;;  %v1325_v41 = vpack.c.bf16 %v1193_v33, %v1193_v33 }
 0x2db   : > { %v2579_v38 = vpop.f32.mrf.mxu0  ;;  %v2587_v39 = vpop.f32.mrf.mxu1  ;;  %2597 = vmatpush3.bf16.xpose.msra.mxu1 %v1333_v37 }
 0x2dc   : > { %2608 = vmatprep.subr.bf16.mxu1 %v3268_v10 }
 0x2dd   : > { %v1314_v42 = vpop.f32.mrf.mxu0 }
 0x2de   : > { %v1315_v43 = vadd.f32 %v2496_v40, %v1314_v42  ;;  %1438 = vrot.lane.b32.xlu1 %v1325_v41, %s3271_s17 }
 0x2df   : > { %v2594_v44 = vpop.f32.mrf.mxu0 }
 0x2e0   : > { %v3815_v45 = vpack.c.bf16 %v1315_v43, %v1315_v43 }
 0x2e1   : > { %v1317_v46 = vpop.f32.mrf.mxu0 }
 0x2e2   : > { %1558 = vrot.lane.b32.xlu1 %v1325_v41, %s3270_s21  ;;  %2599 = vmatmul.mubr.msk.bf16.vlgmr.msra.gmra.mxu1 %vm1328_vm3, %v1325_v41  ;;  %v1394_v47 = vsel %vm1392_vm4, %v3815_v45, 0 }
 0x2e3   : > { %v2595_v48 = vpop.f32.mrf.mxu0  ;;  %2603 = vmatpush3.bf16.msra.mxu0 %v1394_v47  ;;  %2610 = vmatprep.mubr.msk.bf16.mxu1 %vm3269_vm2, %v3268_v10 }
 0x2e4   : > { %2614 = vmatprep.subr.bf16.mxu0 %v3268_v10 }
 0x2e6   : > { %1678 = vrot.lane.b32.xlu1 %v1326_v34, %s3272_s28 }
 0x2ea   : > { %1676 = vrot.lane.b32.xlu1 %v1325_v41, %s3272_s28 }
 0x34c   : > { %v1442_v49 = vpop.permute.xlu1 %1441  ;;  %v1561_v52 = vpop.permute.xlu0 %1560 }
 0x34d   : > { %v1447_v50 = vsel %vm1328_vm3, %v1442_v49, 0  ;;  %v1566_v54 = vsel %vm1328_vm3, %v1561_v52, 0 }
 0x34e   : > { %2609 = vmatpush3.bf16.xpose.msra.mxu1 %v1447_v50 }
 0x34f   : > { %2620 = vmatprep.subr.bf16.mxu1 %v3268_v10 }
 0x350   : > { %v1439_v51 = vpop.permute.xlu1 %1438 }
 0x354   : > { %v1559_v53 = vpop.permute.xlu1 %1558 }
 0x355   : > { %2611 = vmatmul.mubr.msk.bf16.vlgmr.msra.gmra.mxu1 %vm1328_vm3, %v1439_v51 }
 0x356   : > { %2621 = vmatpush3.bf16.xpose.msra.mxu1 %v1566_v54  ;;  %2622 = vmatprep.mubr.msk.bf16.mxu1 %vm3269_vm2, %v3268_v10 }
 0x357   : > { %2632 = vmatprep.subr.bf16.mxu1 %v3268_v10 }
 0x358   : > { %v1679_v55 = vpop.permute.xlu1 %1678 }
 0x359   : > { %v1684_v56 = vsel %vm1328_vm3, %v1679_v55, 0 }
 0x35c   : > { %v1677_v57 = vpop.permute.xlu1 %1676 }
 0x35d   : > { %2623 = vmatmul.mubr.msk.bf16.vlgmr.msra.gmra.mxu1 %vm1328_vm3, %v1559_v53 }
 0x35e   : > { %2633 = vmatpush3.bf16.xpose.msra.mxu1 %v1684_v56  ;;  %2634 = vmatprep.mubr.msk.bf16.mxu1 %vm3269_vm2, %v3268_v10 }
 0x35f   : > { %2644 = vmatprep.subr.bf16.mxu1 %v3268_v10 }
 0x365   : > { %2635 = vmatmul.mubr.msk.bf16.vlgmr.msra.gmra.mxu1 %vm1328_vm3, %v1677_v57 }
 0x366   : > { %2648 = vmatprep.mubr.msk.bf16.mxu1 %vm3269_vm2, %v3268_v10 }
 0x3a2   : > { %v1369_v61 = vpop.f32.mrf.mxu1 }
 0x3a3   : > { %v1375_v62 = vsel %vm1324_vm5, %v1369_v61, -1e+30 }
 0x3a4   : > { %v2600_v63 = vpop.f32.mrf.mxu1  ;;  %v1376_v0 = vsel %vm1328_vm3, %v1375_v62, -inf }
 0x3a5   : > { %1377 = vmax.xlane.f32.xlu1 %v1376_v0 }
 0x3a6   : > { %v1372_v2 = vpop.f32.mrf.mxu1 }
 0x3a8   : > { %v2601_v3 = vpop.f32.mrf.mxu1 }
 0x415   : > { %v1483_v4 = vpop.f32.mrf.mxu1 }
 0x416   : > { %v1489_v5 = vsel %vm1324_vm5, %v1483_v4, -1e+30 }
 0x417   : > { %v2612_v6 = vpop.f32.mrf.mxu1  ;;  %v1490_v7 = vsel %vm1328_vm3, %v1489_v5, -inf }
 0x418   : > { %1491 = vmax.xlane.f32.xlu0 %v1490_v7 }
 0x419   : > { %v1486_v8 = vpop.f32.mrf.mxu1 }
 0x41b   : > { %v2613_v9 = vpop.f32.mrf.mxu1 }
 0x41d   : > { %v1602_v11 = vpop.f32.mrf.mxu1 }
 0x41e   : > { %v1608_v12 = vsel %vm1324_vm5, %v1602_v11, -1e+30 }
 0x41f   : > { %v2624_v13 = vpop.f32.mrf.mxu1  ;;  %v1609_v14 = vsel %vm1328_vm3, %v1608_v12, -inf }
 0x420   : > { %1610 = vmax.xlane.f32.xlu1 %v1609_v14 }
 0x421   : > { %v1605_v15 = vpop.f32.mrf.mxu1 }
 0x423   : > { %v2625_v16 = vpop.f32.mrf.mxu1 }
 0x425   : > { %v1720_v17 = vpop.f32.mrf.mxu1 }
 0x426   : > { %v1726_v18 = vsel %vm1324_vm5, %v1720_v17, -1e+30 }
 0x427   : > { %v2636_v19 = vpop.f32.mrf.mxu1  ;;  %v1727_v20 = vsel %vm1328_vm3, %v1726_v18, -inf }
 0x428   : > { %1728 = vmax.xlane.f32.xlu1 %v1727_v20  ;;  %v2847_v19 = vld [vmem:[%s4179_s23 + $0x8] sm:$0xff]  }
 0x429   : > { %v1723_v21 = vpop.f32.mrf.mxu1  ;;  %2645 = vmatpush3.bf16.msra.mxu1 %v2847_v19  ;;  %v2848_v20 = vld [vmem:[%s4180_s29] sm:$0xff]  }
 0x42a   : > { %2646 = vmatprep.subr.bf16.mxu1 %v3268_v10 }
 0x42b   : > { %v2637_v22 = vpop.f32.mrf.mxu1 }
 0x42d   : > { %2647 = vmatpush3.bf16.msra.mxu1 %v2848_v20 }
 0x42e   : > { %v1378_v23 = vpop.xlane.xlu1 %1377  ;;  %2660 = vmatprep.subr.bf16.mxu1 %v3268_v10 }
 0x42f   : > { %v1379_v24 = vsub.f32 %v1375_v62, %v1378_v23 }
 0x431   : > { %v1380_v25 = vmul.f32 1.442695, %v1379_v24 }
 0x433   : > { %2855 = vpow2.f32 %v1380_v25 }
 0x440   : > { %v2856_v26 = vpop.eup %2855 }
 0x441   : > { %v1382_v27 = vsel %vm1328_vm3, %v2856_v26, 0.0 }
 0x442   : > { %1383 = vadd.xlane.f32.xlu0 %v1382_v27 }
 0x4a1   : > { %v1492_v28 = vpop.xlane.xlu0 %1491 }
 0x4a2   : > { %v1493_v29 = vsub.f32 %v1489_v5, %v1492_v28 }
 0x4a4   : > { %v1494_v30 = vmul.f32 1.442695, %v1493_v29 }
 0x4a6   : > { %2857 = vpow2.f32 %v1494_v30  ;;  %v2508_v30 = vld [vmem:[%s1078_s24] ss:$0 sm:$0xff]  ;;  %s4182_s24 = scalar_lea.vmem [#allocation13], %s3663_s19 }
 0x4a7   : > { %s4183_s22 = smov %s4182_s24 }
 0x4a9   : > { %v1611_v31 = vpop.xlane.xlu1 %1610 }
 0x4aa   : > { %v1612_v32 = vsub.f32 %v1608_v12, %v1611_v31 }
 0x4ac   : > { %v1613_v33 = vmul.f32 1.442695, %v1612_v32 }
 0x4ae   : > { %2859 = vpow2.f32 %v1613_v33 }
 0x4b1   : > { %v1729_v39 = vpop.xlane.xlu1 %1728 }
 0x4b2   : > { %v1730_v40 = vsub.f32 %v1726_v18, %v1729_v39 }
 0x4b3   : > { %v2858_v34 = vpop.eup %2857 }
 0x4b4   : > { %v1496_v35 = vsel %vm1328_vm3, %v2858_v34, 0.0  ;;  %v1731_v41 = vmul.f32 1.442695, %v1730_v40 }
 0x4b5   : > { %1497 = vadd.xlane.f32.xlu1 %v1496_v35 }
 0x4bb   : > { %v2860_v36 = vpop.eup %2859 }
 0x4bc   : > { %v1615_v37 = vsel %vm1328_vm3, %v2860_v36, 0.0 }
 0x4bd   : > { %1616 = vadd.xlane.f32.xlu0 %v1615_v37 }
 0x4c6   : > { %1622 = vrot.lane.b32.xlu1 %v3815_v45, %s3270_s21  ;;  %s4185_s21 = scalar_lea.vmem %s4184_s14, %s3696_s20 }
 0x4cb   : > { %v1384_v38 = vpop.xlane.xlu0 %1383 }
 0x4cc   : > { %2861 = vrcp.f32 %v1384_v38 }
 0x4cd   : > { %2863 = vpow2.f32 %v1731_v41 }
 0x4d3   : > { %1504 = vrot.lane.b32.xlu0 %v3815_v45, %s3271_s17  ;;  %s4186_s17 = scalar_lea.vmem [#allocation4], %s3653_s2 }
 0x4d9   : > { %v2862_v42 = vpop.eup %2861 }
 0x4da   : > { %v1386_v43 = vmul.f32 %v2862_v42, %v2856_v26  ;;  %v2864_v46 = vpop.eup %2863 }
 0x4db   : > { %v1733_v47 = vsel %vm1328_vm3, %v2864_v46, 0.0 }
 0x4dc   : > { %v1388_v44 = vpack.c.bf16 %v1386_v43, %v1386_v43 }
 0x4de   : > { %2605 = vmatmul.mubr.msk.bf16.vlgmr.msra.gmra.mxu0 %vm1328_vm3, %v1388_v44 }
 0x4df   : > { %2616 = vmatprep.mubr.msk.bf16.mxu0 %vm3269_vm2, %v3268_v10 }
 0x4ea   : > { %1734 = vadd.xlane.f32.xlu1 %v1733_v47 }
 0x4fb   : > { %1740 = vrot.lane.b32.xlu1 %v3815_v45, %s3272_s28 }
 0x53e   : > { %v1498_v48 = vpop.xlane.xlu1 %1497 }
 0x53f   : > { %2865 = vrcp.f32 %v1498_v48 }
 0x542   : > { %v1623_v54 = vpop.permute.xlu1 %1622 }
 0x543   : > { %v1628_v56 = vsel %vm1392_vm4, %v1623_v54, 0 }
 0x546   : > { %v1617_v49 = vpop.xlane.xlu0 %1616 }
 0x547   : > { %2867 = vrcp.f32 %v1617_v49  ;;  %v2512_v49 = vld [vmem:[%s4185_s21] ss:$0 sm:$0xff] }
 0x54a   : > { %v1505_v50 = vpop.permute.xlu0 %1504 }
 0x54b   : > { %v1510_v51 = vsel %vm1392_vm4, %v1505_v50, 0 }
 0x54c   : > { %v2866_v52 = vpop.eup %2865  ;;  %2615 = vmatpush3.bf16.msra.mxu0 %v1510_v51  ;;  %v2513_v51 = vld [vmem:[%s4186_s17] ss:$0 sm:$0xff] }
 0x54d   : > { %2626 = vmatprep.subr.bf16.mxu0 %v3268_v10  ;;  %v1500_v53 = vmul.f32 %v2866_v52, %v2858_v34 }
 0x54f   : > { %v1502_v55 = vpack.c.bf16 %v1500_v53, %v1500_v53  ;;  %v1501_v62 = vadd.f32 %v1500_v53, %v1386_v43  ;;  %v2849_v43 = vld [vmem:[%s4182_s24 + $0x8] sm:$0xff]  }
 0x551   : > { %2617 = vmatmul.mubr.msk.bf16.vlgmr.msra.gmra.mxu0 %vm1328_vm3, %v1502_v55  ;;  %v2851_v55 = vld [vmem:[%s922_s9 + $0x8] sm:$0xff]  }
 0x552   : > { %2627 = vmatpush3.bf16.msra.mxu0 %v1628_v56  ;;  %2628 = vmatprep.mubr.msk.bf16.mxu0 %vm3269_vm2, %v3268_v10  ;;  %v2852_v56 = vld [vmem:[%s922_s9] sm:$0xff]  }
 0x553   : > { %2638 = vmatprep.subr.bf16.mxu0 %v3268_v10 }
 0x554   : > { %v2868_v45 = vpop.eup %2867 }
 0x555   : > { %v1619_v57 = vmul.f32 %v2868_v45, %v2860_v36  ;;  %v1094_v45 = vld [vmem:[%s3704_s15] sm:$0xff] }
 0x557   : > { %v1621_v58 = vpack.c.bf16 %v1619_v57, %v1619_v57  ;;  %v1620_v0 = vadd.f32 %v1619_v57, %v1501_v62  ;;  %v3276_v57 = vmov 0  }
 0x558   : > { %2840 = vset.pattern.permute.xlu0 %v3276_v57 }
 0x559   : > { %2629 = vmatmul.mubr.msk.bf16.vlgmr.msra.gmra.mxu0 %vm1328_vm3, %v1621_v58  ;;  %v2514_v58 = vld [vmem:[%s1081_s13] ss:$0 sm:$0xff]  ;;  %s4189_s13 = sld [smem:[#allocation32_spill]] }
 0x55a   : > { %2640 = vmatprep.mubr.msk.bf16.mxu0 %vm3269_vm2, %v3268_v10 }
 0x55f   : > { %p2522_p0 = scmp.ne.s32.totalorder %s4189_s13, 2 }
 0x560   : > { %s4190_s7 = sld [smem:[#allocation64_spill]] (!%p2522_p0) }
 0x573   : > { %v1735_v59 = vpop.xlane.xlu1 %1734 }
 0x574   : > { %2869 = vrcp.f32 %v1735_v59 }
 0x577   : > { %v1741_v60 = vpop.permute.xlu1 %1740 }
 0x578   : > { %v1746_v61 = vsel %vm1392_vm4, %v1741_v60, 0 }
 0x579   : > { %2639 = vmatpush3.bf16.msra.mxu0 %v1746_v61 }
 0x57a   : > { %2652 = vmatprep.subr.bf16.mxu0 %v3268_v10 }
 0x581   : > { %v2870_v63 = vpop.eup %2869 }
 0x582   : > { %v1737_v2 = vmul.f32 %v2870_v63, %v2864_v46 }
 0x584   : > { %v1738_v3 = vadd.f32 %v1737_v2, %v1620_v0  ;;  %v1739_v4 = vpack.c.bf16 %v1737_v2, %v1737_v2  ;;  %v2518_v2 = vld [vmem:[%s1084_s6] ss:$0 sm:$0xff] }
 0x586   : > { %2641 = vmatmul.mubr.msk.bf16.vlgmr.msra.gmra.mxu0 %vm1328_vm3, %v1739_v4  ;;  %v1794_v5 = vmul.f32 0.25, %v1738_v3 }
 0x587   : > { %2656 = vmatprep.mubr.msk.bf16.mxu0 %vm3269_vm2, %v3268_v10  ;;  %2653 = vmatpush3.bf16.msra.mxu0 %v2849_v43 }
 0x588   : > { %1795 = vst.msk [vmem:[%s1049_s16] sm:$0xff] %vm1328_vm3, %v1794_v5  ;;  %2654 = vmatprep.subr.bf16.mxu0 %v3268_v10 }
 0x59e   : > { %v1430_v6 = vpop.f32.mrf.mxu0 }
 0x59f   : > { %1436 = vst.msk [vmem:[#allocation3] sm:$0xff] %vm1328_vm3, %v1430_v6 }
 0x5a0   : > { %v2606_v7 = vpop.f32.mrf.mxu0 }
 0x5a2   : > { %v1433_v8 = vpop.f32.mrf.mxu0 }
 0x5a4   : > { %v2607_v9 = vpop.f32.mrf.mxu0 }
 0x611   : > { %v1546_v11 = vpop.f32.mrf.mxu0 }
 0x612   : > { %1553 = vrot.lane.b32.xlu0 %v1546_v11, %s3273_s10 }
 0x613   : > { %v2618_v12 = vpop.f32.mrf.mxu0 }
 0x615   : > { %v1549_v13 = vpop.f32.mrf.mxu0 }
 0x617   : > { %v2619_v14 = vpop.f32.mrf.mxu0 }
 0x619   : > { %v1664_v15 = vpop.f32.mrf.mxu0 }
 0x61a   : > { %1671 = vrot.lane.b32.xlu1 %v1664_v15, %s3274_s30  ;;  %s4191_s30 = sld [smem:[#allocation65_spill]] (!%p2522_p0) }
 0x61b   : > { %v2630_v16 = vpop.f32.mrf.mxu0 }
 0x61d   : > { %v1667_v17 = vpop.f32.mrf.mxu0 }
 0x61f   : > { %v2631_v18 = vpop.f32.mrf.mxu0 }
 0x646   : > { %v1782_v21 = vpop.f32.mrf.mxu0 }
 0x647   : > { %1789 = vrot.lane.b32.xlu0 %v1782_v21, %s3275_s4 }
 0x648   : > { %v2642_v22 = vpop.f32.mrf.mxu0 }
 0x64a   : > { %v1785_v23 = vpop.f32.mrf.mxu0 }
 0x64c   : > { %v2643_v24 = vpop.f32.mrf.mxu0 }
 0x684   : > { %v1554_v25 = vpop.permute.xlu0 %1553 }
 0x685   : > { %1557 = vst.msk [vmem:[#allocation3] sm:$0xff] %vm1556_vm6, %v1554_v25 }
 0x68c   : > { %v1672_v26 = vpop.permute.xlu1 %1671 }
 0x68d   : > { %1675 = vst.msk [vmem:[#allocation3] sm:$0xff] %vm1674_vm7, %v1672_v26 }
 0x6b9   : > { %v1790_v27 = vpop.permute.xlu0 %1789 }
 0x6ba   : > { %1793 = vst.msk [vmem:[#allocation3] sm:$0xff] %vm1792_vm8, %v1790_v27 }
 0x6c1   : > { %v1796_v28 = vld [vmem:[#allocation3] sm:$0xff] }
 0x6c2   : > { %v1797_v29 = vpack.c.bf16 %v1796_v28, %v1796_v28 }
 0x6c4   : > { %2649 = vmatmul.mubr.msk.bf16.vlgmr.msra.gmra.mxu1 %vm1097_vm1, %v1797_v29 }
 0x6c5   : > { %2664 = vmatprep.mubr.msk.bf16.mxu1 %vm3269_vm2, %v3268_v10  ;;  %2661 = vmatpush3.bf16.msra.mxu1 %v2851_v55 }
 0x6c6   : > { %2662 = vmatprep.subr.bf16.mxu1 %v3268_v10 }
 0x6c9   : > { %2663 = vmatpush3.bf16.msra.mxu1 %v2852_v56 }
 0x784   : > { %v1858_v31 = vpop.f32.mrf.mxu1 }
 0x785   : > { %v1859_v32 = vadd.f32 %v2508_v30, %v1858_v31 }
 0x786   : > { %v2650_v33 = vpop.f32.mrf.mxu1 }
 0x787   : > { %v1864_v34 = vadd.f32 %v1859_v32, %v3746_v1  ;;  %v2850_v1 = vld [vmem:[%s4183_s22] sm:$0xff]  }
 0x788   : > { %v1861_v35 = vpop.f32.mrf.mxu1  ;;  %2655 = vmatpush3.bf16.msra.mxu0 %v2850_v1 }
 0x789   : > { %v1867_v36 = vsel %vm1097_vm1, %v1864_v34, 0.0 }
 0x78a   : > { %1868 = vadd.xlane.f32.xlu1 %v1867_v36  ;;  %v2651_v37 = vpop.f32.mrf.mxu1 }
 0x813   : > { %v1869_v38 = vpop.xlane.xlu1 %1868 }
 0x814   : > { %v1870_v39 = vmul.f32 0.03125, %v1869_v38 }
 0x816   : > { %v1871_v40 = vsub.f32 %v1864_v34, %v1870_v39 }
 0x818   : > { %v1872_v41 = vmul.f32 %v1871_v40, %v1871_v40 }
 0x81a   : > { %v1873_v42 = vsel %vm1097_vm1, %v1872_v41, 0.0 }
 0x81b   : > { %1874 = vadd.xlane.f32.xlu0 %v1873_v42 }
 0x831   : > { %2032 = vperm.xlu0 %2840, %v1094_v45  }
 0x8a4   : > { %v1875_v44 = vpop.xlane.xlu0 %1874 }
 0x8a5   : > { %v1876_v46 = vmul.f32 0.03125, %v1875_v44 }
 0x8a7   : > { %v1877_v47 = vadd.f32 1e-05, %v1876_v46 }
 0x8a9   : > { %2871 = vrsqrt.f32 %v1877_v47 }
 0x8ac   : > { %v2033_v6 = vpop.permute.xlu0 %2032 }
 0x8b6   : > { %v2872_v48 = vpop.eup %2871 }
 0x8b7   : > { %v1879_v50 = vmul.f32 %v2872_v48, %v1871_v40 }
 0x8b9   : > { %v1886_v52 = vmul.f32 %v2512_v49, %v1879_v50 }
 0x8bb   : > { %v1893_v53 = vadd.f32 %v2513_v51, %v1886_v52 }
 0x8bd   : > { %v1894_v54 = vpack.c.bf16 %v1893_v53, %v1893_v53 }
 0x8bf   : > { %2657 = vmatmul.mubr.msk.bf16.vlgmr.msra.gmra.mxu0 %vm1097_vm1, %v1894_v54 }
 0x97f   : > { %v1955_v59 = vpop.f32.mrf.mxu0 }
 0x980   : > { %v1956_v60 = vadd.f32 %v2514_v58, %v1955_v59 }
 0x981   : > { %v2658_v61 = vpop.f32.mrf.mxu0 }
 0x982   : > { %v1961_v62 = vmax.f32 %v1956_v60, 0.0 }
 0x983   : > { %v1958_v63 = vpop.f32.mrf.mxu0 }
 0x984   : > { %v1962_v0 = vpack.c.bf16 %v1961_v62, %v1961_v62 }
 0x985   : > { %v2659_v10 = vpop.f32.mrf.mxu0 }
 0x986   : > { %2665 = vmatmul.mubr.msk.bf16.vlgmr.msra.gmra.mxu1 %vm1097_vm1, %v1962_v0 }
 0xa46   : > { %v2023_v3 = vpop.f32.mrf.mxu1 }
 0xa47   : > { %v2024_v4 = vadd.f32 %v2518_v2, %v2023_v3 }
 0xa48   : > { %v2666_v5 = vpop.f32.mrf.mxu1 }
 0xa49   : > { %v2029_v7 = vadd.f32 %v2024_v4, %v1864_v34  ;;  %2040 = sbr.rel (%p2522_p0) target bundleno = 2947 (0xb83), region = 136 }
 0xa4a   : > { %v2026_v8 = vpop.f32.mrf.mxu1 }
 0xa4b   : > { %v2035_v9 = vmul.f32 %v2033_v6, %v2029_v7 }
 0xa4c   : > { %v2667_v11 = vpop.f32.mrf.mxu1 }
 0xa4d   : > { %2036 = vst.msk [vmem:[#allocation2] sm:$0xff] %vm1097_vm1, %v2035_v9 }
 0xa4e   : > { %v2043_v12 = vsel %vm1097_vm1, %v2035_v9, 0.0  ;;  %v2523_v22 = vld [vmem:[%s4190_s7] ss:$0 sm:$0xff] }
 0xa4f   : > { %2044 = vadd.xlane.f32.xlu0 %v2043_v12  ;;  %v2524_v24 = vld [vmem:[%s4191_s30] ss:$0 sm:$0xff] }
 0xad8   : > { %v2045_v13 = vpop.xlane.xlu0 %2044 }
 0xad9   : > { %v2046_v14 = vmul.f32 0.03125, %v2045_v13 }
 0xadb   : > { %v2047_v15 = vsub.f32 %v2035_v9, %v2046_v14 }
 0xadd   : > { %v2048_v16 = vmul.f32 %v2047_v15, %v2047_v15 }
 0xadf   : > { %v2049_v17 = vsel %vm1097_vm1, %v2048_v16, 0.0 }
 0xae0   : > { %2050 = vadd.xlane.f32.xlu0 %v2049_v17 }
 0xb69   : > { %v2051_v18 = vpop.xlane.xlu0 %2050 }
 0xb6a   : > { %v2052_v19 = vmul.f32 0.03125, %v2051_v18 }
 0xb6c   : > { %v2053_v20 = vadd.f32 1e-05, %v2052_v19 }
 0xb6e   : > { %2873 = vrsqrt.f32 %v2053_v20 }
 0xb7b   : > { %v2874_v21 = vpop.eup %2873 }
 0xb7c   : > { %v2055_v23 = vmul.f32 %v2874_v21, %v2047_v15 }
 0xb7e   : > { %v2062_v25 = vmul.f32 %v2523_v22, %v2055_v23 }
 0xb80   : > { %v2069_v26 = vadd.f32 %v2524_v24, %v2062_v25 }
 0xb82   : > { %2070 = vst.msk [vmem:[%s1042_s11] sm:$0xff] %vm1097_vm1, %v2069_v26 }
 0xb83 PF: > { %s4192_s23 = sld [smem:[#allocation33_spill]]  ;;  %s2090_s27 = sshll.u32 %s1042_s11, 4  ;;  %s2091_s27 = int_to_ptr.vmem [resolvable:$true] %s2090_s27 }
 0xb84   : > { %s4193_s29 = sld [smem:[#allocation29_spill]]  ;;  %s3071_s21 = scalar_lea.vmem %s2091_s27, 128 }
 0xb85   : > { %s4195_s24 = sld [smem:[#allocation66_spill]]  ;;  %p3072_p9 = scmp.ne.s32.totalorder %s2091_s27, %s3071_s21 }
 0xb86   : > { %s3277_s17 = smov [#allocation16]  }
 0xb87   : > { %p3073_p1 = pnand %p3072_p9, %p3496_p12  ;;  %s3075_s2 = sshll.u32 %s3277_s17, 4  ;;  %s3076_s2 = int_to_ptr.vmem [resolvable:$false] %s3075_s2 }
 0xb88   : > { %s3077_s26 = scalar_lea.vmem %s3076_s2, 256  ;;  %p3078_p4 = scmp.lt.s32.totalorder %s2091_s27, %s3076_s2 }
 0xb89   : > { %s2527_s5 = sshll.u32 %s4192_s23, 7  ;;  %p3074_p6 = pneg %p3073_p1 }
 0xb8a   : > { %s4196_s18 = sand.u32 1, %s4193_s29   ;;  %p3079_p7 = scmp.lt.s32.totalorder %s3077_s26, %s3071_s21 }
 0xb8b   : > { %s2088_s22 = scalar_lea.hbm %s4195_s24, %s2527_s5  ;;  %s2072_s14 = scalar_lea.sflag [#allocation6], %s4196_s18 }
 0xb8c   : > { %p3080_p11 = por %p3079_p7, %p3078_p4 }
 0xb8e   : > { %p3081_p13 = pnand %p3080_p11, %p3074_p6 }
 0xb90   : > { %3084 = shalt.err (!%p3081_p13)
}
 0xb91   : > { %s3085_s25 = scalar_lea.hbm %s2088_s22, 128  ;;  %s3089_s19 = scalar_lea.hbm %s4195_s24, 256 }
 0xb92   : > { %p3086_p10 = scmp.ne.s32.totalorder %s2088_s22, %s3085_s25  ;;  %p3090_p0 = scmp.lt.s32.totalorder %s2088_s22, %s4195_s24 }
 0xb93   : > { %p3091_p9 = scmp.lt.s32.totalorder %s3089_s19, %s3085_s25 }
 0xb94   : > { %p3087_p3 = pnand %p3086_p10, %p3496_p12 }
 0xb95   : > { %p3092_p1 = por %p3091_p9, %p3090_p0 }
 0xb96   : > { %p3088_p8 = pneg %p3087_p3 }
 0xb98   : > { %p3093_p2 = pnand %p3092_p1, %p3088_p8 }
 0xb9a   : > { %3096 = shalt.err (!%p3093_p2)
}
 0xb9b   : > { %s4197_s13 = sld [smem:[#allocation32_spill]]  ;;  %s2105_s28 = sshll.u32 %s1049_s16, 4  ;;  %s2106_s28 = int_to_ptr.vmem [resolvable:$true] %s2105_s28 }
 0xb9c   : > { %s4198_s20 = sld [smem:[#allocation26_spill]]  ;;  %s3097_s17 = scalar_lea.vmem %s2106_s28, 128 }
 0xb9d   : > { %2682 = dma.vmem_to_hbm [thread:$0]  (%p3496_p12), %s2091_s27, 128, %s2088_s22, %s2072_s14  }
 0xb9e   : > { %s4200_s12 = sld [smem:[#allocation67_spill]]  ;;  %p3098_p2 = scmp.ne.s32.totalorder %s2106_s28, %s3097_s17 }
 0xb9f   : > { %s3278_s4 = smov [#allocation17]  }
 0xba0   : > { %p3099_p6 = pnand %p3098_p2, %p3512_p5  ;;  %s3101_s2 = sshll.u32 %s3278_s4, 4  ;;  %s3102_s2 = int_to_ptr.vmem [resolvable:$false] %s3101_s2 }
 0xba1   : > { %s2528_s7 = sshll.u32 %s4197_s13, 1  ;;  %s3103_s22 = scalar_lea.vmem %s3102_s2, 256 }
 0xba2   : > { %s2101_s10 = sadd.s32 %s4192_s23, %s2528_s7  ;;  %s4201_s18 = sand.u32 1, %s4198_s20  }
 0xba3   : > { %s2529_s30 = sshll.u32 %s2101_s10, 7  ;;  %s2077_s21 = scalar_lea.sflag [#allocation18], %s4201_s18 }
 0xba4   : > { %s2103_s8 = scalar_lea.hbm %s4200_s12, %s2529_s30  ;;  %p3100_p4 = pneg %p3099_p6 }
 0xba5   : > { %p3104_p12 = scmp.lt.s32.totalorder %s2106_s28, %s3102_s2  ;;  %p3105_p7 = scmp.lt.s32.totalorder %s3103_s22, %s3097_s17 }
 0xba7   : > { %p3106_p11 = por %p3105_p7, %p3104_p12 }
 0xba9   : > { %p3107_p13 = pnand %p3106_p11, %p3100_p4 }
 0xbab   : > { %3110 = shalt.err (!%p3107_p13)
}
 0xbac   : > { %s3111_s1 = scalar_lea.hbm %s2103_s8, 128  ;;  %s3115_s27 = scalar_lea.hbm %s4200_s12, 768 }
 0xbad   : > { %p3112_p10 = scmp.ne.s32.totalorder %s2103_s8, %s3111_s1  ;;  %p3116_p0 = scmp.lt.s32.totalorder %s2103_s8, %s4200_s12 }
 0xbae   : > { %p3117_p9 = scmp.lt.s32.totalorder %s3115_s27, %s3111_s1 }
 0xbaf   : > { %p3113_p3 = pnand %p3112_p10, %p3512_p5 }
 0xbb0   : > { %p3118_p1 = por %p3117_p9, %p3116_p0 }
 0xbb1   : > { %p3114_p8 = pneg %p3113_p3 }
 0xbb3   : > { %p3119_p2 = pnand %p3118_p1, %p3114_p8 }
 0xbb5   : > { %3122 = shalt.err (!%p3119_p2)
}
 0xbb6   : > { %2683 = dma.vmem_to_hbm [thread:$0]  (%p3512_p5), %s2106_s28, 128, %s2103_s8, %s2077_s21  }
 0xbb7 PF: > { %s4202_s25 = sld [smem:[#allocation36_spill]] }
 0xbb8   : > { %s4203_s3 = sld [smem:[#allocation28_spill]] }
 0xbb9   : > { %s4204_s11 = sld [smem:[#allocation42_spill]] }
 0xbbd   : > { %p2716_p6 = scmp.ge.s32.totalorder %s4202_s25, 2 }
 0xbbe   : > { %s2117_s19 = sand.u32 1, %s4203_s3  }
 0xbbf   : > { %p4205_p4 = scmp.ne.s32.totalorder %s4204_s11, 0  ;;  %s2118_s9 = scalar_lea.sflag [#allocation6], %s2117_s19 }
 0xbc1   : > { %p2709_p12 = pnand %p2716_p6, %p4205_p4 }
 0xbc3   : > { %p2710_p7 = pneg %p2709_p12 }
 0xbc5   : > { %3196 = dma.done.wait (%p2710_p7), %s2118_s9, 128  }
 0xbc6   : > { %3198 = vsyncadd (%p2710_p7), %s2118_s9, 4294967168  ;;  %s4206_s15 = sld [smem:[#allocation25_spill]] }
 0xbc7   : > { %s4207_s13 = sld [smem:[#allocation45_spill]] }
 0xbcc   : > { %s2126_s20 = sand.u32 1, %s4206_s15  }
 0xbcd   : > { %p4208_p11 = scmp.ne.s32.totalorder %s4207_s13, 0  ;;  %s2127_s6 = scalar_lea.sflag [#allocation18], %s2126_s20 }
 0xbcf   : > { %p2712_p13 = pnand %p2716_p6, %p4208_p11 }
 0xbd1   : > { %p2713_p10 = pneg %p2712_p13 }
 0xbd3   : > { %3200 = dma.done.wait (%p2713_p10), %s2127_s6, 128  }
 0xbd4   : > { %3202 = vsyncadd (%p2713_p10), %s2127_s6, 4294967168  ;;  %s50_s1 = sadd.s32 1, %s4202_s25   ;;  %s4210_s2 = sld [smem:[#allocation26_spill]] }
 0xbd5   : > { %p3990_p5 = scmp.ge.s32.totalorder %s50_s1, 8   ;;  %s4211_s25 = sld [smem:[#allocation27_spill]] }
 0xbd6   : > { %s4212_s26 = sld [smem:[#allocation43_spill]]  ;;  %s4222_s29 = smov %s3233_s0 }
 0xbd7   : > { %s4213_s27 = sld [smem:[#allocation29_spill]] }
 0xbd8   : > { %s4214_s3 = sld [smem:[#allocation30_spill]] }
 0xbd9   : > { %s4215_s28 = sld [smem:[#allocation40_spill]] }
 0xbda   : > { %s4216_s10 = sld [smem:[#allocation31_spill]] }
 0xbdb   : > { %s4217_s4 = sld [smem:[#allocation39_spill]] }
 0xbdc   : > { %s4218_s30 = sld [smem:[#allocation34_spill]]  ;;  %49 = sbr.rel (!%p3990_p5) target bundleno = 41 (0x29), region = 275 }
 0xbdd   : > { %s4219_s5 = sld [smem:[#allocation35_spill]] }
 0xbde   : > { %s4220_s22 = sld [smem:[#allocation37_spill]] }
 0xbdf   : > { %s4221_s23 = sld [smem:[#allocation38_spill]] }
 0xbe0   : > { %s4223_s0 = smov %s4216_s10 }
 0xbe1   :  { %2132 = vsyncpa [#allocation5], 1 }
 0xbe2   :  { %2134 = vsyncpa [#allocation5 + $0x1], 1 }
 0xbe3   :  { %2135 = vsyncpa [#allocation8], 1 }
 0xbe4   :  { %2137 = vsyncpa [#allocation8 + $0x1], 1 }
 0xbe5   :  { %2138 = vsyncpa [#allocation11], 1 }
 0xbe6   :  { %2140 = vsyncpa [#allocation11 + $0x1], 1 }
 0xbe7   :  { %2141 = vsyncpa [#allocation14], 1 }
 0xbe8   :  { %2143 = vsyncpa [#allocation14 + $0x1], 1 }
 0xbe9   :  { %2144 = vsyncpa [#allocation6], 1 }
 0xbea   :  { %2146 = vsyncpa [#allocation6 + $0x1], 1 }
 0xbeb   :  { %2147 = vsyncpa [#allocation18], 1 }
 0xbec   :  { %2149 = vsyncpa [#allocation18 + $0x1], 1 }

</bundles_post_ra>
